<compile_context>
chip_gen: v7x
topology: tpu7x:2x2x1
jax: 0.10.0
libtpu: 0.0.40
codegen_flags: <defaults>
</compile_context>

<pallas_src>
import functools

import jax
import jax.numpy as jnp
from jax.experimental import pallas as pl
from jax.experimental.pallas import tpu as pltpu


def _projection_head_kernel(x_ref, w1_ref, w2_ref, ln_ref, o_ref, *, eps, l2_normalize):
    """One (head, batch-tile) block of Projection_Head.forward (+ optional F.normalize).

    x_ref  : [TB, in_c]     compute dtype (bf16 / f32)
    w1_ref : [in_c, out_c]  compute dtype  (pre-transposed [K, N] layout)
    w2_ref : [out_c, out_c] compute dtype
    ln_ref : [4, out_c]     f32, rows = (b1, b2, gamma, beta)
    o_ref  : [TB, out_c]
    """
    x = x_ref[...]
    b1 = ln_ref[0:1, :]
    b2 = ln_ref[1:2, :]
    gamma = ln_ref[2:3, :]
    beta = ln_ref[3:4, :]

    # fc: projected = x @ W1 + b1  (MXU, f32 accumulation)
    projected = jnp.dot(x, w1_ref[...], preferred_element_type=jnp.float32) + b1

    # relu -> fc2 (re-cast to the weight dtype so the MXU sees matched operands)
    h = jnp.maximum(projected, 0.0)
    h = jnp.dot(h.astype(w2_ref.dtype), w2_ref[...],
                preferred_element_type=jnp.float32) + b2

    # dropout: identity in eval mode.

    # residual from the pre-ReLU fc output, as in the reference module
    y = h + projected

    # LayerNorm over channels (biased variance, eps=1e-5), mean-subtracted two-pass
    n = y.shape[-1]
    mean = jnp.sum(y, axis=-1, keepdims=True) * (1.0 / n)
    yc = y - mean
    var = jnp.sum(yc * yc, axis=-1, keepdims=True) * (1.0 / n)
    out = yc * (jax.lax.rsqrt(var + eps) * gamma) + beta

    if l2_normalize:
        # F.normalize(p=2): x / max(||x||_2, 1e-12) == x * rsqrt(max(sum(x^2), 1e-24))
        ss = jnp.sum(out * out, axis=-1, keepdims=True)
        out = out * jax.lax.rsqrt(jnp.maximum(ss, 1e-24))

    o_ref[...] = out.astype(o_ref.dtype)


def _vmem_capacity_bytes():
    try:
        return int(pltpu.get_tpu_info().vmem_capacity_bytes)
    except Exception:
        return 64 * 1024 * 1024      # conservative: v7x per-TC physical VMEM


def fused_projection_heads(x, w1, w2, ln, *, eps=1e-5, l2_normalize=True,
                           block_b=None, compute_dtype=None):
    """Runs H independent Projection_Heads in a single pallas_call.

    x  : [H, B, in_c]       per-head input features
    w1 : [H, in_c, out_c]   fc weight, already transposed to [in, out]
    w2 : [H, out_c, out_c]  fc2 weight, already transposed
    ln : [H, 4, out_c] f32  packed (b1, b2, gamma, beta)
    """
    H, B, in_c = x.shape
    out_c = w1.shape[-1]
    assert w1.shape == (H, in_c, out_c)
    assert w2.shape == (H, out_c, out_c)
    assert ln.shape == (H, 4, out_c)

    cdt = jnp.dtype(compute_dtype) if compute_dtype is not None else jnp.dtype(x.dtype)
    x = x.astype(cdt)
    w1 = w1.astype(cdt)
    w2 = w2.astype(cdt)
    ln = jnp.asarray(ln, jnp.float32)

    itemsize = cdt.itemsize
    sub = 8 * max(1, 4 // itemsize)          # dtype-native sublane multiple: 8 / 16 / 32

    # --- generation-aware VMEM budget --------------------------------------
    vmem_cap = _vmem_capacity_bytes()
    budget = int(vmem_cap * 0.45)            # ~29 MiB on v7x, ~57 MiB on v5e/v6e
    tb_cap = 4096 if vmem_cap >= 96 * 1024 * 1024 else 2048

    # resident (constant-index) weights; counted x2 in case the runtime double-buffers
    weight_bytes = 2 * ((in_c * out_c + out_c * out_c) * itemsize + 4 * out_c * 4)
    # double-buffered activation tiles + generous allowance for the live f32 temporaries
    bytes_per_row = 2 * (in_c + out_c) * itemsize + 8 * out_c * 4

    if block_b is None:
        avail = max(budget - weight_bytes, 1 << 20)
        tb = int(max(sub, min(tb_cap, (avail // bytes_per_row) // sub * sub)))
    else:
        tb = int(block_b)
    if tb >= B:
        tb = B                               # single full-extent block along batch
    nb = pl.cdiv(B, tb)

    kernel = functools.partial(_projection_head_kernel, eps=eps,
                               l2_normalize=l2_normalize)

    try:
        flops = 2 * H * B * (in_c * out_c + out_c * out_c) + 10 * H * B * out_c
        bytes_accessed = ((x.size + w1.size + w2.size) * itemsize
                          + ln.size * 4 + H * B * out_c * itemsize)
        cost = pl.CostEstimate(flops=int(flops), transcendentals=int(2 * H * B),
                               bytes_accessed=int(bytes_accessed))
    except Exception:
        cost = None

    def build(single_buffer_weights):
        resident_kw = {}
        if single_buffer_weights:
            # Resident weights are fetched once per head; double-buffering them
            # only doubles their VMEM footprint.
            resident_kw = dict(pipeline_mode=pl.Buffered(1))

        def resident_spec(shape):
            return pl.BlockSpec((None,) + shape, lambda h, i: (h, 0, 0), **resident_kw)

        return pl.pallas_call(
            kernel,
            out_shape=jax.ShapeDtypeStruct((H, B, out_c), cdt),
            grid=(H, nb),                    # head axis outermost: weights DMA'd once per head
            in_specs=[
                pl.BlockSpec((None, tb, in_c), lambda h, i: (h, i, 0)),  # activations, batch-tiled
                resident_spec((in_c, out_c)),                            # W1 (resident per head)
                resident_spec((out_c, out_c)),                           # W2 (resident per head)
                resident_spec((4, out_c)),                               # packed b1/b2/gamma/beta
            ],
            out_specs=pl.BlockSpec((None, tb, out_c), lambda h, i: (h, i, 0)),
            compiler_params=pltpu.CompilerParams(
                dimension_semantics=("parallel", "parallel"),  # heads + batch tiles shard across TCs
                vmem_limit_bytes=budget,
            ),
            cost_estimate=cost,
        )

    try:
        return build(True)(x, w1, w2, ln)
    except Exception:
        # pipeline_mode=pl.Buffered(1) unsupported on this JAX/Mosaic version; fall back.
        return build(False)(x, w1, w2, ln)


def main_backbone_forward(normal_feat, abnormal_feat, normal_params, abnormal_params,
                          *, compute_dtype=jnp.bfloat16):
    """Main_Backbone.forward, given the backbone's final [B, C] features.

    Each params tuple is in PyTorch layout: (w1 [out,in], b1, w2 [out,out], b2, gamma, beta).
    """
    def pack(params):
        w1, b1, w2, b2, gamma, beta = params
        # one-time HBM-side transpose to the canonical MXU [K, N] layout
        w1_t = jnp.transpose(jnp.asarray(w1))
        w2_t = jnp.transpose(jnp.asarray(w2))
        ln = jnp.stack([jnp.asarray(b1, jnp.float32),
                        jnp.asarray(b2, jnp.float32),
                        jnp.asarray(gamma, jnp.float32),
                        jnp.asarray(beta, jnp.float32)], axis=0)
        return w1_t, w2_t, ln

    n_w1, n_w2, n_ln = pack(normal_params)
    a_w1, a_w2, a_ln = pack(abnormal_params)

    x = jnp.stack([normal_feat, abnormal_feat], axis=0)     # [2, B, in_c]
    w1 = jnp.stack([n_w1, a_w1], axis=0)                    # [2, in_c, out_c]
    w2 = jnp.stack([n_w2, a_w2], axis=0)                    # [2, out_c, out_c]
    ln = jnp.stack([n_ln, a_ln], axis=0)                    # [2, 4, out_c]

    out = fused_projection_heads(x, w1, w2, ln, l2_normalize=True,
                                 compute_dtype=compute_dtype)
    return out[0], out[1]


# ---------------- pure-JAX reference ----------------

def _projection_head_ref(x, w1, b1, w2, b2, gamma, beta, eps=1e-5):
    projected = x @ w1.T + b1
    h = jnp.maximum(projected, 0.0)
    h = h @ w2.T + b2
    y = h + projected
    mean = jnp.mean(y, axis=-1, keepdims=True)
    var = jnp.mean((y - mean) ** 2, axis=-1, keepdims=True)
    return (y - mean) / jnp.sqrt(var + eps) * gamma + beta


def _l2_normalize_ref(x, eps=1e-12):
    n = jnp.sqrt(jnp.sum(x * x, axis=-1, keepdims=True))
    return x / jnp.maximum(n, eps)


if __name__ == "__main__":
    B = 16
    visual_input_dim = 256   # in_channel of the image projection heads
    out_dim = 128            # lane-dense (multiple of 128) output channels

    key = jax.random.PRNGKey(0)
    k_np, k_ap, k_fx, k_fz = jax.random.split(key, 4)

    def init_head(k):
        kw1, kw2 = jax.random.split(k)
        w1 = jax.random.normal(kw1, (out_dim, visual_input_dim), jnp.float32) * (2.0 / out_dim) ** 0.5
        b1 = jnp.zeros((out_dim,), jnp.float32)
        w2 = jax.random.normal(kw2, (out_dim, out_dim), jnp.float32) * (2.0 / out_dim) ** 0.5
        b2 = jnp.zeros((out_dim,), jnp.float32)
        gamma = jnp.ones((out_dim,), jnp.float32)
        beta = jnp.zeros((out_dim,), jnp.float32)
        return (w1, b1, w2, b2, gamma, beta)

    normal_params = init_head(k_np)
    abnormal_params = init_head(k_ap)

    # Stand-ins for backbone(x)[-1] / backbone(z)[-1] features.
    feat_x = jax.random.normal(k_fx, (B, visual_input_dim), dtype=jnp.float32)
    feat_z = jax.random.normal(k_fz, (B, visual_input_dim), dtype=jnp.float32)

    nf_ref = _l2_normalize_ref(_projection_head_ref(feat_x, *normal_params))
    af_ref = _l2_normalize_ref(_projection_head_ref(feat_z, *abnormal_params))

    # f32 path: strict correctness check.
    nf32, af32 = main_backbone_forward(feat_x, feat_z, normal_params, abnormal_params,
                                       compute_dtype=jnp.float32)
    nf32, af32 = jax.block_until_ready((nf32, af32))
    assert nf32.shape == (B, out_dim) and af32.shape == (B, out_dim)
    assert jnp.allclose(nf32, nf_ref, atol=2e-4, rtol=2e-4), "normal features mismatch (f32)"
    assert jnp.allclose(af32, af_ref, atol=2e-4, rtol=2e-4), "abnormal features mismatch (f32)"

    # bf16 MXU path (default): looser check against the f32 reference on the
    # L2-normalized (unit-norm) outputs.
    nf, af = main_backbone_forward(feat_x, feat_z, normal_params, abnormal_params)
    nf, af = jax.block_until_ready((nf, af))
    assert nf.shape == (B, out_dim) and af.shape == (B, out_dim)
    assert jnp.allclose(nf.astype(jnp.float32), nf_ref, atol=3e-2, rtol=0.0), \
        "normal features mismatch (bf16)"
    assert jnp.allclose(af.astype(jnp.float32), af_ref, atol=3e-2, rtol=0.0), \
        "abnormal features mismatch (bf16)"

    print("KERNEL_OK")
</pallas_src>

<mosaic_0001>
module attributes {stable_mosaic.version = 11 : i64} {
  func.func @_projection_head_kernel(%arg0: i32, %arg1: i32, %arg2: memref<1x16x256xf32, #tpu.memory_space<vmem>>, %arg3: memref<1x256x128xf32, #tpu.memory_space<vmem>>, %arg4: memref<1x128x128xf32, #tpu.memory_space<vmem>>, %arg5: memref<1x4x128xf32, #tpu.memory_space<vmem>>, %arg6: memref<1x16x128xf32, #tpu.memory_space<vmem>>) attributes {dimension_semantics = [#tpu.dimension_semantics<parallel>, #tpu.dimension_semantics<parallel>], iteration_bounds = array<i64: 2, 1>, scalar_prefetch = 0 : i64, scratch_operands = 0 : i64, tpu.core_type = #tpu.core_type<tc>, window_params = [{transform_indices = @transform_0, window_bounds = array<i64: 1, 16, 256>}, {pipeline_mode = #tpu.pipeline_mode<synchronous>, transform_indices = @transform_1, window_bounds = array<i64: 1, 256, 128>}, {pipeline_mode = #tpu.pipeline_mode<synchronous>, transform_indices = @transform_2, window_bounds = array<i64: 1, 128, 128>}, {pipeline_mode = #tpu.pipeline_mode<synchronous>, transform_indices = @transform_3, window_bounds = array<i64: 1, 4, 128>}, {transform_indices = @transform_4, window_bounds = array<i64: 1, 16, 128>}]} {
    %c0 = arith.constant 0 : index
    %c0_0 = arith.constant 0 : index
    %c0_1 = arith.constant 0 : index
    %0 = vector.load %arg2[%c0, %c0_0, %c0_1] : memref<1x16x256xf32, #tpu.memory_space<vmem>>, vector<1x16x256xf32>
    %1 = vector.shape_cast %0 : vector<1x16x256xf32> to vector<16x256xf32>
    %c0_2 = arith.constant 0 : index
    %c0_3 = arith.constant 0 : index
    %c0_4 = arith.constant 0 : index
    %2 = vector.load %arg5[%c0_2, %c0_3, %c0_4] : memref<1x4x128xf32, #tpu.memory_space<vmem>>, vector<1x1x128xf32>
    %3 = vector.shape_cast %2 : vector<1x1x128xf32> to vector<1x128xf32>
    %c0_5 = arith.constant 0 : index
    %c1 = arith.constant 1 : index
    %c0_6 = arith.constant 0 : index
    %4 = vector.load %arg5[%c0_5, %c1, %c0_6] : memref<1x4x128xf32, #tpu.memory_space<vmem>>, vector<1x1x128xf32>
    %5 = vector.shape_cast %4 : vector<1x1x128xf32> to vector<1x128xf32>
    %c0_7 = arith.constant 0 : index
    %c2 = arith.constant 2 : index
    %c0_8 = arith.constant 0 : index
    %6 = vector.load %arg5[%c0_7, %c2, %c0_8] : memref<1x4x128xf32, #tpu.memory_space<vmem>>, vector<1x1x128xf32>
    %7 = vector.shape_cast %6 : vector<1x1x128xf32> to vector<1x128xf32>
    %c0_9 = arith.constant 0 : index
    %c3 = arith.constant 3 : index
    %c0_10 = arith.constant 0 : index
    %8 = vector.load %arg5[%c0_9, %c3, %c0_10] : memref<1x4x128xf32, #tpu.memory_space<vmem>>, vector<1x1x128xf32>
    %9 = vector.shape_cast %8 : vector<1x1x128xf32> to vector<1x128xf32>
    %c0_11 = arith.constant 0 : index
    %c0_12 = arith.constant 0 : index
    %c0_13 = arith.constant 0 : index
    %10 = vector.load %arg3[%c0_11, %c0_12, %c0_13] : memref<1x256x128xf32, #tpu.memory_space<vmem>>, vector<1x256x128xf32>
    %11 = vector.shape_cast %10 : vector<1x256x128xf32> to vector<256x128xf32>
    %cst = arith.constant dense<0.000000e+00> : vector<16x128xf32>
    %12 = tpu.matmul %1, %11, %cst {dimension_numbers = #tpu.dot_dimension_numbers<[1], [0], [0], [1], [0, 0, 1, 1], [], []>} : vector<16x256xf32>, vector<256x128xf32>, vector<16x128xf32> -> vector<16x128xf32>
    %13 = vector.broadcast %3 : vector<1x128xf32> to vector<16x128xf32>
    %14 = arith.addf %12, %13 : vector<16x128xf32>
    %cst_14 = arith.constant 0.000000e+00 : f32
    %15 = vector.broadcast %cst_14 : f32 to vector<16x128xf32>
    %16 = arith.maximumf %14, %15 : vector<16x128xf32>
    %c0_15 = arith.constant 0 : index
    %c0_16 = arith.constant 0 : index
    %c0_17 = arith.constant 0 : index
    %17 = vector.load %arg4[%c0_15, %c0_16, %c0_17] : memref<1x128x128xf32, #tpu.memory_space<vmem>>, vector<1x128x128xf32>
    %18 = vector.shape_cast %17 : vector<1x128x128xf32> to vector<128x128xf32>
    %cst_18 = arith.constant dense<0.000000e+00> : vector<16x128xf32>
    %19 = tpu.matmul %16, %18, %cst_18 {dimension_numbers = #tpu.dot_dimension_numbers<[1], [0], [0], [1], [0, 0, 1, 1], [], []>} : vector<16x128xf32>, vector<128x128xf32>, vector<16x128xf32> -> vector<16x128xf32>
    %20 = vector.broadcast %5 : vector<1x128xf32> to vector<16x128xf32>
    %21 = arith.addf %19, %20 : vector<16x128xf32>
    %22 = arith.addf %21, %14 : vector<16x128xf32>
    %cst_19 = arith.constant dense<0.000000e+00> : vector<16xf32>
    %23 = vector.multi_reduction <add>, %22, %cst_19 [1] : vector<16x128xf32> to vector<16xf32>
    %24 = vector.shape_cast %23 : vector<16xf32> to vector<16x1xf32>
    %cst_20 = arith.constant 7.812500e-03 : f32
    %25 = vector.broadcast %cst_20 : f32 to vector<16x1xf32>
    %26 = arith.mulf %24, %25 : vector<16x1xf32>
    %27 = vector.broadcast %26 : vector<16x1xf32> to vector<16x128xf32>
    %28 = arith.subf %22, %27 : vector<16x128xf32>
    %29 = arith.mulf %28, %28 : vector<16x128xf32>
    %cst_21 = arith.constant dense<0.000000e+00> : vector<16xf32>
    %30 = vector.multi_reduction <add>, %29, %cst_21 [1] : vector<16x128xf32> to vector<16xf32>
    %31 = vector.shape_cast %30 : vector<16xf32> to vector<16x1xf32>
    %cst_22 = arith.constant 7.812500e-03 : f32
    %32 = vector.broadcast %cst_22 : f32 to vector<16x1xf32>
    %33 = arith.mulf %31, %32 : vector<16x1xf32>
    %cst_23 = arith.constant 9.99999974E-6 : f32
    %34 = vector.broadcast %cst_23 : f32 to vector<16x1xf32>
    %35 = arith.addf %33, %34 : vector<16x1xf32>
    %36 = math.rsqrt %35 : vector<16x1xf32>
    %37 = vector.broadcast %36 : vector<16x1xf32> to vector<16x128xf32>
    %38 = vector.broadcast %7 : vector<1x128xf32> to vector<16x128xf32>
    %39 = arith.mulf %37, %38 : vector<16x128xf32>
    %40 = arith.mulf %28, %39 : vector<16x128xf32>
    %41 = vector.broadcast %9 : vector<1x128xf32> to vector<16x128xf32>
    %42 = arith.addf %40, %41 : vector<16x128xf32>
    %43 = arith.mulf %42, %42 : vector<16x128xf32>
    %cst_24 = arith.constant dense<0.000000e+00> : vector<16xf32>
    %44 = vector.multi_reduction <add>, %43, %cst_24 [1] : vector<16x128xf32> to vector<16xf32>
    %45 = vector.shape_cast %44 : vector<16xf32> to vector<16x1xf32>
    %cst_25 = arith.constant 1.000000e-24 : f32
    %46 = vector.broadcast %cst_25 : f32 to vector<16x1xf32>
    %47 = arith.maximumf %45, %46 : vector<16x1xf32>
    %48 = math.rsqrt %47 : vector<16x1xf32>
    %49 = vector.broadcast %48 : vector<16x1xf32> to vector<16x128xf32>
    %50 = arith.mulf %42, %49 : vector<16x128xf32>
    %c0_26 = arith.constant 0 : index
    %c0_27 = arith.constant 0 : index
    %c0_28 = arith.constant 0 : index
    %51 = vector.load %arg6[%c0_26, %c0_27, %c0_28] : memref<1x16x128xf32, #tpu.memory_space<vmem>>, vector<1x16x128xf32>
    %52 = vector.shape_cast %51 : vector<1x16x128xf32> to vector<16x128xf32>
    %53 = vector.shape_cast %50 : vector<16x128xf32> to vector<1x16x128xf32>
    tpu.vector_store %arg6[%c0_26, %c0_27, %c0_28], %53 {strides = array<i32>} : memref<1x16x128xf32, #tpu.memory_space<vmem>>, vector<1x16x128xf32>,
    return
  }
  func.func @transform_0(%arg0: i32, %arg1: i32) -> (i32, i32, i32) {
    %c0_i32 = arith.constant 0 : i32
    %c0_i32_0 = arith.constant 0 : i32
    return %arg0, %arg1, %c0_i32 : i32, i32, i32
  }
  func.func @transform_1(%arg0: i32, %arg1: i32) -> (i32, i32, i32) {
    %c0_i32 = arith.constant 0 : i32
    %c0_i32_0 = arith.constant 0 : i32
    %c0_i32_1 = arith.constant 0 : i32
    return %arg0, %c0_i32, %c0_i32_0 : i32, i32, i32
  }
  func.func @transform_2(%arg0: i32, %arg1: i32) -> (i32, i32, i32) {
    %c0_i32 = arith.constant 0 : i32
    %c0_i32_0 = arith.constant 0 : i32
    %c0_i32_1 = arith.constant 0 : i32
    return %arg0, %c0_i32, %c0_i32_0 : i32, i32, i32
  }
  func.func @transform_3(%arg0: i32, %arg1: i32) -> (i32, i32, i32) {
    %c0_i32 = arith.constant 0 : i32
    %c0_i32_0 = arith.constant 0 : i32
    %c0_i32_1 = arith.constant 0 : i32
    return %arg0, %c0_i32, %c0_i32_0 : i32, i32, i32
  }
  func.func @transform_4(%arg0: i32, %arg1: i32) -> (i32, i32, i32) {
    %c0_i32 = arith.constant 0 : i32
    %c0_i32_0 = arith.constant 0 : i32
    return %arg0, %arg1, %c0_i32 : i32, i32, i32
  }
}

module attributes {stable_mosaic.version = 11 : i64} {
  func.func @_projection_head_kernel(%arg0: i32, %arg1: i32, %arg2: memref<1x16x256xf32, #tpu.memory_space<vmem>>, %arg3: memref<1x256x128xf32, #tpu.memory_space<vmem>>, %arg4: memref<1x128x128xf32, #tpu.memory_space<vmem>>, %arg5: memref<1x4x128xf32, #tpu.memory_space<vmem>>, %arg6: memref<1x16x128xf32, #tpu.memory_space<vmem>>) attributes {dimension_semantics = [#tpu.dimension_semantics<parallel>, #tpu.dimension_semantics<parallel>], iteration_bounds = array<i64: 2, 1>, scalar_prefetch = 0 : i64, scratch_operands = 0 : i64, tpu.core_type = #tpu.core_type<tc>, window_params = [{transform_indices = @transform_0, window_bounds = array<i64: 1, 16, 256>}, {transform_indices = @transform_1, window_bounds = array<i64: 1, 256, 128>}, {transform_indices = @transform_2, window_bounds = array<i64: 1, 128, 128>}, {transform_indices = @transform_3, window_bounds = array<i64: 1, 4, 128>}, {transform_indices = @transform_4, window_bounds = array<i64: 1, 16, 128>}]} {
    %c0 = arith.constant 0 : index
    %c0_0 = arith.constant 0 : index
    %c0_1 = arith.constant 0 : index
    %0 = vector.load %arg2[%c0, %c0_0, %c0_1] : memref<1x16x256xf32, #tpu.memory_space<vmem>>, vector<1x16x256xf32>
    %1 = vector.shape_cast %0 : vector<1x16x256xf32> to vector<16x256xf32>
    %c0_2 = arith.constant 0 : index
    %c0_3 = arith.constant 0 : index
    %c0_4 = arith.constant 0 : index
    %2 = vector.load %arg5[%c0_2, %c0_3, %c0_4] : memref<1x4x128xf32, #tpu.memory_space<vmem>>, vector<1x1x128xf32>
    %3 = vector.shape_cast %2 : vector<1x1x128xf32> to vector<1x128xf32>
    %c0_5 = arith.constant 0 : index
    %c1 = arith.constant 1 : index
    %c0_6 = arith.constant 0 : index
    %4 = vector.load %arg5[%c0_5, %c1, %c0_6] : memref<1x4x128xf32, #tpu.memory_space<vmem>>, vector<1x1x128xf32>
    %5 = vector.shape_cast %4 : vector<1x1x128xf32> to vector<1x128xf32>
    %c0_7 = arith.constant 0 : index
    %c2 = arith.constant 2 : index
    %c0_8 = arith.constant 0 : index
    %6 = vector.load %arg5[%c0_7, %c2, %c0_8] : memref<1x4x128xf32, #tpu.memory_space<vmem>>, vector<1x1x128xf32>
    %7 = vector.shape_cast %6 : vector<1x1x128xf32> to vector<1x128xf32>
    %c0_9 = arith.constant 0 : index
    %c3 = arith.constant 3 : index
    %c0_10 = arith.constant 0 : index
    %8 = vector.load %arg5[%c0_9, %c3, %c0_10] : memref<1x4x128xf32, #tpu.memory_space<vmem>>, vector<1x1x128xf32>
    %9 = vector.shape_cast %8 : vector<1x1x128xf32> to vector<1x128xf32>
    %c0_11 = arith.constant 0 : index
    %c0_12 = arith.constant 0 : index
    %c0_13 = arith.constant 0 : index
    %10 = vector.load %arg3[%c0_11, %c0_12, %c0_13] : memref<1x256x128xf32, #tpu.memory_space<vmem>>, vector<1x256x128xf32>
    %11 = vector.shape_cast %10 : vector<1x256x128xf32> to vector<256x128xf32>
    %cst = arith.constant dense<0.000000e+00> : vector<16x128xf32>
    %12 = tpu.matmul %1, %11, %cst {dimension_numbers = #tpu.dot_dimension_numbers<[1], [0], [0], [1], [0, 0, 1, 1], [], []>} : vector<16x256xf32>, vector<256x128xf32>, vector<16x128xf32> -> vector<16x128xf32>
    %13 = vector.broadcast %3 : vector<1x128xf32> to vector<16x128xf32>
    %14 = arith.addf %12, %13 : vector<16x128xf32>
    %cst_14 = arith.constant 0.000000e+00 : f32
    %15 = vector.broadcast %cst_14 : f32 to vector<16x128xf32>
    %16 = arith.maximumf %14, %15 : vector<16x128xf32>
    %c0_15 = arith.constant 0 : index
    %c0_16 = arith.constant 0 : index
    %c0_17 = arith.constant 0 : index
    %17 = vector.load %arg4[%c0_15, %c0_16, %c0_17] : memref<1x128x128xf32, #tpu.memory_space<vmem>>, vector<1x128x128xf32>
    %18 = vector.shape_cast %17 : vector<1x128x128xf32> to vector<128x128xf32>
    %cst_18 = arith.constant dense<0.000000e+00> : vector<16x128xf32>
    %19 = tpu.matmul %16, %18, %cst_18 {dimension_numbers = #tpu.dot_dimension_numbers<[1], [0], [0], [1], [0, 0, 1, 1], [], []>} : vector<16x128xf32>, vector<128x128xf32>, vector<16x128xf32> -> vector<16x128xf32>
    %20 = vector.broadcast %5 : vector<1x128xf32> to vector<16x128xf32>
    %21 = arith.addf %19, %20 : vector<16x128xf32>
    %22 = arith.addf %21, %14 : vector<16x128xf32>
    %cst_19 = arith.constant dense<0.000000e+00> : vector<16xf32>
    %23 = vector.multi_reduction <add>, %22, %cst_19 [1] : vector<16x128xf32> to vector<16xf32>
    %24 = vector.shape_cast %23 : vector<16xf32> to vector<16x1xf32>
    %cst_20 = arith.constant 7.812500e-03 : f32
    %25 = vector.broadcast %cst_20 : f32 to vector<16x1xf32>
    %26 = arith.mulf %24, %25 : vector<16x1xf32>
    %27 = vector.broadcast %26 : vector<16x1xf32> to vector<16x128xf32>
    %28 = arith.subf %22, %27 : vector<16x128xf32>
    %29 = arith.mulf %28, %28 : vector<16x128xf32>
    %cst_21 = arith.constant dense<0.000000e+00> : vector<16xf32>
    %30 = vector.multi_reduction <add>, %29, %cst_21 [1] : vector<16x128xf32> to vector<16xf32>
    %31 = vector.shape_cast %30 : vector<16xf32> to vector<16x1xf32>
    %cst_22 = arith.constant 7.812500e-03 : f32
    %32 = vector.broadcast %cst_22 : f32 to vector<16x1xf32>
    %33 = arith.mulf %31, %32 : vector<16x1xf32>
    %cst_23 = arith.constant 9.99999974E-6 : f32
    %34 = vector.broadcast %cst_23 : f32 to vector<16x1xf32>
    %35 = arith.addf %33, %34 : vector<16x1xf32>
    %36 = math.rsqrt %35 : vector<16x1xf32>
    %37 = vector.broadcast %36 : vector<16x1xf32> to vector<16x128xf32>
    %38 = vector.broadcast %7 : vector<1x128xf32> to vector<16x128xf32>
    %39 = arith.mulf %37, %38 : vector<16x128xf32>
    %40 = arith.mulf %28, %39 : vector<16x128xf32>
    %41 = vector.broadcast %9 : vector<1x128xf32> to vector<16x128xf32>
    %42 = arith.addf %40, %41 : vector<16x128xf32>
    %43 = arith.mulf %42, %42 : vector<16x128xf32>
    %cst_24 = arith.constant dense<0.000000e+00> : vector<16xf32>
    %44 = vector.multi_reduction <add>, %43, %cst_24 [1] : vector<16x128xf32> to vector<16xf32>
    %45 = vector.shape_cast %44 : vector<16xf32> to vector<16x1xf32>
    %cst_25 = arith.constant 1.000000e-24 : f32
    %46 = vector.broadcast %cst_25 : f32 to vector<16x1xf32>
    %47 = arith.maximumf %45, %46 : vector<16x1xf32>
    %48 = math.rsqrt %47 : vector<16x1xf32>
    %49 = vector.broadcast %48 : vector<16x1xf32> to vector<16x128xf32>
    %50 = arith.mulf %42, %49 : vector<16x128xf32>
    %c0_26 = arith.constant 0 : index
    %c0_27 = arith.constant 0 : index
    %c0_28 = arith.constant 0 : index
    %51 = vector.load %arg6[%c0_26, %c0_27, %c0_28] : memref<1x16x128xf32, #tpu.memory_space<vmem>>, vector<1x16x128xf32>
    %52 = vector.shape_cast %51 : vector<1x16x128xf32> to vector<16x128xf32>
    %53 = vector.shape_cast %50 : vector<16x128xf32> to vector<1x16x128xf32>
    tpu.vector_store %arg6[%c0_26, %c0_27, %c0_28], %53 {strides = array<i32>} : memref<1x16x128xf32, #tpu.memory_space<vmem>>, vector<1x16x128xf32>,
    return
  }
  func.func @transform_0(%arg0: i32, %arg1: i32) -> (i32, i32, i32) {
    %c0_i32 = arith.constant 0 : i32
    %c0_i32_0 = arith.constant 0 : i32
    return %arg0, %arg1, %c0_i32 : i32, i32, i32
  }
  func.func @transform_1(%arg0: i32, %arg1: i32) -> (i32, i32, i32) {
    %c0_i32 = arith.constant 0 : i32
    %c0_i32_0 = arith.constant 0 : i32
    %c0_i32_1 = arith.constant 0 : i32
    return %arg0, %c0_i32, %c0_i32_0 : i32, i32, i32
  }
  func.func @transform_2(%arg0: i32, %arg1: i32) -> (i32, i32, i32) {
    %c0_i32 = arith.constant 0 : i32
    %c0_i32_0 = arith.constant 0 : i32
    %c0_i32_1 = arith.constant 0 : i32
    return %arg0, %c0_i32, %c0_i32_0 : i32, i32, i32
  }
  func.func @transform_3(%arg0: i32, %arg1: i32) -> (i32, i32, i32) {
    %c0_i32 = arith.constant 0 : i32
    %c0_i32_0 = arith.constant 0 : i32
    %c0_i32_1 = arith.constant 0 : i32
    return %arg0, %c0_i32, %c0_i32_0 : i32, i32, i32
  }
  func.func @transform_4(%arg0: i32, %arg1: i32) -> (i32, i32, i32) {
    %c0_i32 = arith.constant 0 : i32
    %c0_i32_0 = arith.constant 0 : i32
    return %arg0, %arg1, %c0_i32 : i32, i32, i32
  }
}

</mosaic_0001>

<bundles_post_ra>
// kernel: tpu_custom_call.1
= control target key start
LH: loop header
LB: loop body
LE: loop exit
PB: predicated region body
PF: predicated region fallthrough
CT: control target
= control target key end

     0   :  { %9 = vsyncpa [#allocation3], 0  ;;  %s1464_s0 = inlined_call_operand.hbm [shape: f32[2,16,256], index: 0, kind: input, shape index: {}]   ;;  %s1465_s1 = inlined_call_operand.hbm [shape: f32[2,256,128], index: 1, kind: input, shape index: {}]   ;;  %s1466_s2 = inlined_call_operand.hbm [shape: f32[2,128,128], index: 2, kind: input, shape index: {}]   ;;  %s1467_s3 = inlined_call_operand.vmem [shape: f32[2,4,128], index: 3, kind: input, shape index: {}]   ;;  %s1468_s4 = inlined_call_operand.hbm [shape: f32[2,16,128], index: 4, kind: output, shape index: {}]  }
   0x1   :  { %11 = vsyncpa [#allocation3 + $0x1], 0 }
   0x2   :  { %12 = vsyncpa [#allocation6], 0 }
   0x3   :  { %13 = vsyncpa [#allocation4], 0 }
   0x4   :  { %15 = vsyncpa [#allocation4 + $0x1], 0  ;;  %s1191_s15 = smov 0   ;;  %s1193_s16 = smov 0  }
   0x5   :  { %s1195_s17 = smov 0   ;;  %s1197_s18 = smov 0  }
   0x6   :  { %s1199_s19 = smov 0   ;;  %s1201_s20 = smov 0  }
   0x7 LB: > { %s706_s21 = sadd.s32 4294967295, %s1154_s20   ;;  %s707_s22 = sadd.s32 4294967294, %s1154_s20   ;;  %s1154_s20 = sphi %s1201_s20, %s21_s20   ;;  %s1150_s19 = sphi %s1199_s19, %s1488_s19   ;;  %s1146_s18 = sphi %s1197_s18, %s1487_s18   ;;  %s1142_s17 = sphi %s1195_s17, %s1486_s17   ;;  %s1138_s16 = sphi %s1193_s16, %s1485_s16   ;;  %s1134_s15 = sphi %s1191_s15, %s1484_s15  }
   0x8   : > { %p55_p0 = scmp.ne.s32.totalorder %s1138_s16, %s1134_s15  ;;  %p56_p1 = scmp.eq.s32.totalorder %s706_s21, 0 }
   0x9   : > { %p1225_p2 = scmp.eq.s32.totalorder %s706_s21, 1  ;;  %p165_p3 = scmp.eq.s32.totalorder %s707_s22, 1 }
   0xa   : > { %p1229_p4 = por %p56_p1, %p55_p0  ;;  %p708_p5 = scmp.ge.s32.totalorder %s1154_s20, 1 }
   0xb   : > { %s1472_s23 = scalar_select %p1225_p2, 1, 0 }
   0xc   : > { %s1473_s24 = scalar_select %p1229_p4, 1, 0 }
   0xd   : > { %p1234_p6 = por %p165_p3, %p55_p0  ;;  %p172_p7 = scmp.lt.s32.totalorder %s1154_s20, 3 }
   0xe   : > { %s730_s26 = sshll.u32 %s1146_s18, 12  ;;  %s1156_s5 = smov [#allocation5]  }
   0xf   : > { %s1474_s25 = scalar_select %p1234_p6, 1, 0 }
  0x10   : > { %p1240_p8 = pnand %p708_p5, %p172_p7  ;;  %s1247_s30 = scalar_lea.hbm %s1465_s1, %s730_s26 }
  0x11   : > { %s187_s6 = sshll.u32 %s1156_s5, 4  ;;  %s731_s7 = sshll.u32 %s1146_s18, 11  ;;  %s1251_s6 = int_to_ptr.vmem [resolvable:$true] %s187_s6 }
  0x12   : > { %s1475_s27 = scalar_select %p1240_p8, 1, 0 }
  0x13   : > { %p897_p9 = pneg %p1240_p8  ;;  %s1263_s11 = scalar_lea.hbm %s1466_s2, %s731_s7 }
  0x14   : > { %s1157_s12 = smov [#allocation7]   ;;  %s978_s14 = scalar_lea.hbm %s1247_s30, 4096 }
  0x15   : > { %p1256_p10 = pnand %p897_p9, %p1229_p4  ;;  %s1266_s13 = sshll.u32 %s1157_s12, 4  ;;  %s204_s13 = int_to_ptr.vmem [resolvable:$true] %s1266_s13 }
  0x16   : > { %p979_p12 = scmp.ne.s32.totalorder %s1247_s30, %s978_s14  ;;  %s983_s26 = scalar_lea.hbm %s1465_s1, 8192 }
  0x17   : > { %p980_p13 = pneg %p1256_p10  ;;  %p984_p3 = scmp.lt.u32.totalorder %s1247_s30, %s1465_s1 }
  0x18   : > { %p985_p5 = scmp.lt.u32.totalorder %s983_s26, %s978_s14  ;;  %p987_p9 = scmp.lt.u32.totalorder %s978_s14, %s1247_s30 }
  0x19   : > { %p981_p0 = pnand %p980_p13, %p979_p12 }
  0x1a   : > { %p986_p7 = por %p985_p5, %p984_p3 }
  0x1b   : > { %p982_p1 = pneg %p981_p0 }
  0x1c   : > { %p988_p11 = por %p987_p9, %p986_p7 }
  0x1e   : > { %p989_p6 = pnand %p988_p11, %p982_p1 }
  0x20   : > { %992 = shalt.err (!%p989_p6)
}
  0x21   : > { %s993_s5 = scalar_lea.vmem %s1251_s6, 4096  ;;  %p1001_p8 = scmp.lt.s32.totalorder %s1251_s6, %s1251_s6 }
  0x22   : > { %p994_p12 = scmp.ne.s32.totalorder %s1251_s6, %s993_s5  ;;  %p1002_p2 = scmp.lt.s32.totalorder %s993_s5, %s993_s5 }
  0x24   : > { %p996_p0 = pnand %p994_p12, %p980_p13  ;;  %p1003_p3 = por %p1002_p2, %p1001_p8 }
  0x26   : > { %p997_p4 = pneg %p996_p0 }
  0x28   : > { %p1004_p5 = pnand %p1003_p3, %p997_p4 }
  0x2a   : > { %1007 = shalt.err (!%p1004_p5)
}
  0x2b   : > { %s1158_s7 = smov 128   ;;  %s1159_s9 = smov 8  }
  0x2c   : > { %900 = dma.hbm_to_vmem [thread:$0]  (!%p1256_p10), %s1247_s30, 4096, %s1251_s6, [#allocation6], %s1158_s7, %s1158_s7, %s1159_s9  }
  0x2d   : > { %s1008_s10 = scalar_lea.hbm %s1263_s11, 2048  ;;  %s1013_s21 = scalar_lea.hbm %s1466_s2, 4096 }
  0x2e   : > { %p1009_p6 = scmp.ne.s32.totalorder %s1263_s11, %s1008_s10  ;;  %p1014_p8 = scmp.lt.u32.totalorder %s1263_s11, %s1466_s2 }
  0x2f   : > { %p1015_p11 = scmp.lt.u32.totalorder %s1013_s21, %s1008_s10  ;;  %p1017_p7 = scmp.lt.u32.totalorder %s1008_s10, %s1263_s11 }
  0x30   : > { %p1011_p2 = pnand %p1009_p6, %p980_p13 }
  0x31   : > { %p1016_p1 = por %p1015_p11, %p1014_p8 }
  0x32   : > { %p1012_p4 = pneg %p1011_p2 }
  0x33   : > { %p1018_p9 = por %p1017_p7, %p1016_p1 }
  0x35   : > { %p1019_p12 = pnand %p1018_p9, %p1012_p4 }
  0x37   : > { %1022 = shalt.err (!%p1019_p12)
}
  0x38   : > { %s1023_s30 = scalar_lea.vmem %s204_s13, 2048  ;;  %p1031_p6 = scmp.lt.s32.totalorder %s204_s13, %s204_s13 }
  0x39   : > { %p1024_p0 = scmp.ne.s32.totalorder %s204_s13, %s1023_s30  ;;  %p1032_p2 = scmp.lt.s32.totalorder %s1023_s30, %s1023_s30 }
  0x3b   : > { %p1026_p3 = pnand %p1024_p0, %p980_p13  ;;  %p1033_p8 = por %p1032_p2, %p1031_p6 }
  0x3d   : > { %p1027_p5 = pneg %p1026_p3 }
  0x3f   : > { %p1034_p11 = pnand %p1033_p8, %p1027_p5 }
  0x41   : > { %1037 = shalt.err (!%p1034_p11)
}
  0x42   : > { %903 = dma.hbm_to_vmem [thread:$0]  (!%p1256_p10), %s1263_s11, 2048, %s204_s13, [#allocation6], %s1158_s7, %s1158_s7, %s1159_s9  }
  0x43   : > { %s42_s6 = sadd.s32 1, %s1142_s17  ;;  %s33_s28 = sadd.s32 1, %s1150_s19 }
  0x44   : > { %p49_p13 = scmp.ne.s32.totalorder %s1142_s17, %s1138_s16  ;;  %p35_p4 = scmp.ge.s32.totalorder %s33_s28, 2 }
  0x45   : > { %p50_p1 = scmp.eq.s32.totalorder %s1154_s20, 0  ;;  %p1477_p7 = scmp.ne.s32.totalorder %s1472_s23, 0 }
  0x46   : > { %p912_p12 = scmp.lt.s32.totalorder %s1154_s20, 2  ;;  %s1490_s28 = smov (%p35_p4, %s33_s28), 0 }
  0x47   : > { %p1321_p9 = por %p1477_p7, %p49_p13  ;;  %p51_p0 = por %p50_p1, %p49_p13 }
  0x48   : > { %s224_s29 = sand.u32 1, %s1142_s17   ;;  %s37_s5 = ssub.s32 %s1150_s19, %s1490_s28 }
  0x49   : > { %p40_p3 = scmp.eq.s32.totalorder %s37_s5, 0  ;;  %s714_s11 = sshll.u32 %s224_s29, 5 }
  0x4a   : > { %s732_s13 = sshll.u32 %s1150_s19, 9  ;;  %s228_s12 = scalar_lea.vmem [#allocation2], %s714_s11 }
  0x4b   : > { %s1333_s7 = scalar_select %p40_p3, %s1142_s17, %s42_s6  }
  0x4c   : > { %s1338_s23 = scalar_lea.hbm %s1464_s0, %s732_s13  ;;  %s238_s14 = sshll.u32 %s228_s12, 4  ;;  %s1340_s14 = int_to_ptr.vmem [resolvable:$true] %s238_s14 }
  0x4d   : > { %p1344_p10 = pnand %p912_p12, %p51_p0  ;;  %s1348_s22 = scalar_lea.sflag [#allocation3], %s224_s29 }
  0x4e   : > { %s1038_s26 = scalar_lea.hbm %s1338_s23, 512  ;;  %s1043_s5 = scalar_lea.hbm %s1464_s0, 1024 }
  0x4f   : > { %p1039_p5 = scmp.ne.s32.totalorder %s1338_s23, %s1038_s26  ;;  %p1040_p6 = pneg %p1344_p10 }
  0x50   : > { %p1044_p11 = scmp.lt.u32.totalorder %s1338_s23, %s1464_s0  ;;  %p1045_p13 = scmp.lt.u32.totalorder %s1043_s5, %s1038_s26 }
  0x51   : > { %p1041_p2 = pnand %p1040_p6, %p1039_p5  ;;  %p1047_p1 = scmp.lt.u32.totalorder %s1038_s26, %s1338_s23 }
  0x52   : > { %p1046_p4 = por %p1045_p13, %p1044_p11 }
  0x53   : > { %p1042_p8 = pneg %p1041_p2 }
  0x54   : > { %p1048_p7 = por %p1047_p1, %p1046_p4 }
  0x56   : > { %p1049_p12 = pnand %p1048_p7, %p1042_p8 }
  0x58   : > { %1052 = shalt.err (!%p1049_p12)
}
  0x59   : > { %s1053_s29 = scalar_lea.vmem %s1340_s14, 512  ;;  %s1160_s9 = smov [#allocation2]  }
  0x5a   : > { %p1054_p0 = scmp.ne.s32.totalorder %s1340_s14, %s1053_s29  ;;  %s1058_s10 = sshll.u32 %s1160_s9, 4  ;;  %s1059_s10 = int_to_ptr.vmem [resolvable:$false] %s1058_s10 }
  0x5b   : > { %s1060_s12 = scalar_lea.vmem %s1059_s10, 1024  ;;  %p1061_p2 = scmp.lt.s32.totalorder %s1340_s14, %s1059_s10 }
  0x5c   : > { %p1056_p3 = pnand %p1054_p0, %p1040_p6  ;;  %p1062_p11 = scmp.lt.s32.totalorder %s1060_s12, %s1053_s29 }
  0x5e   : > { %p1057_p5 = pneg %p1056_p3  ;;  %p1063_p13 = por %p1062_p11, %p1061_p2 }
  0x60   : > { %p1064_p4 = pnand %p1063_p13, %p1057_p5 }
  0x62   : > { %1067 = shalt.err (!%p1064_p4)
}
  0x63   : > { %s1161_s26 = smov 256   ;;  %s1162_s30 = smov 16  }
  0x64   : > { %907 = dma.hbm_to_vmem [thread:$0]  (!%p1344_p10), %s1338_s23, 512, %s1340_s14, %s1348_s22, %s1161_s26, %s1161_s26, %s1162_s30  }
  0x65   : > { %p1480_p6 = scmp.ne.s32.totalorder %s1475_s27, 0 }
  0x66   : > { %s1379_s6 = sand.u32 (!%p1480_p6), 1, %s1138_s16   ;;  %p1481_p8 = scmp.ne.s32.totalorder (!%p1480_p6), %s1473_s24, 0 }
  0x67   : > { %250 = sbr.rel (%p1480_p6) target bundleno = 1077 (0x435), region = 36  ;;  %s718_s5 = sshll.u32 (!%p1480_p6), %s1379_s6, 5 }
  0x68   : > { %s253_s11 = scalar_lea.sflag (!%p1480_p6), [#allocation3], %s1379_s6  ;;  %s1383_s13 = scalar_lea.vmem (!%p1480_p6), [#allocation2], %s718_s5 }
  0x6e   : > { %1121 = dma.done.wait (%p1481_p8), %s253_s11, 512  }
  0x6f   : > { %1123 = vsyncadd (%p1481_p8), %s253_s11, 4294966784 }
  0x70   : > { %1125 = dma.done.wait (%p1481_p8), [#allocation6], 6144  }
  0x71   : > { %1127 = vsyncadd (%p1481_p8), [#allocation6], 4294961152  ;;  %v323_v0 = vld [vmem:[#allocation5 + $0x80] sm:$0xff]  ;;  %v324_v1 = vld [vmem:[#allocation5 + $0x88] sm:$0xff]  ;;  %p294_p10 = scmp.lt.s32.totalorder %s1146_s18, 1  ;;  %s719_s22 = sshll.u32 %s1379_s6, 4 }
  0x72   : > { %v307_v2 = vld [vmem:[#allocation5] sm:$0xff]  ;;  %v825_v3 = vpack.c.bf16 %v324_v1, %v323_v0  ;;  %v308_v4 = vld [vmem:[#allocation5 + $0x8] sm:$0xff]  ;;  %v325_v5 = vld [vmem:[#allocation5 + $0x90] sm:$0xff]  ;;  %s733_s29 = sshll.u32 %s1146_s18, 8  ;;  %s292_s9 = scalar_lea.vmem [#allocation8], %s719_s22 }
  0x73   : > { %v326_v6 = vld [vmem:[#allocation5 + $0x98] sm:$0xff]  ;;  %v827_v7 = vpack.c.bf16 %v308_v4, %v307_v2  ;;  %v309_v9 = vld [vmem:[#allocation5 + $0x10] sm:$0xff]  ;;  %v327_v11 = vld [vmem:[#allocation5 + $0xa0] sm:$0xff]  ;;  %s295_s24 = scalar_select %p294_p10, %s1146_s18, 1 }
  0x74   : > { %v829_v8 = vpack.c.bf16 %v326_v6, %v325_v5  ;;  %v310_v10 = vld [vmem:[#allocation5 + $0x18] sm:$0xff]  ;;  %826 = vmatprep.subr.bf16.mxu0 %v825_v3  ;;  %v328_v12 = vld [vmem:[#allocation5 + $0xa8] sm:$0xff]  ;;  %v311_v15 = vld [vmem:[#allocation5 + $0x20] sm:$0xff]  ;;  %s581_s10 = sshll.u32 %s292_s9, 4  ;;  %s1413_s30 = scalar_lea.hbm %s1468_s4, %s733_s29  ;;  %s1415_s10 = int_to_ptr.vmem [resolvable:$true] %s581_s10 }
  0x75   : > { %828 = vmatpush3.bf16.msra.mxu0 %v827_v7  ;;  %v831_v13 = vpack.c.bf16 %v310_v10, %v309_v9  ;;  %v833_v14 = vpack.c.bf16 %v328_v12, %v327_v11  ;;  %v312_v16 = vld [vmem:[#allocation5 + $0x28] sm:$0xff]  ;;  %v329_v17 = vld [vmem:[#allocation5 + $0xb0] sm:$0xff]  ;;  %v330_v18 = vld [vmem:[#allocation5 + $0xb8] sm:$0xff]  ;;  %s720_s27 = sshll.u32 %s295_s24, 2  ;;  %s566_s5 = scalar_lea.sflag [#allocation4], %s1379_s6 }
  0x76   : > { %830 = vmatprep.subr.bf16.mxu0 %v829_v8  ;;  %v835_v19 = vpack.c.bf16 %v312_v16, %v311_v15  ;;  %v837_v20 = vpack.c.bf16 %v330_v18, %v329_v17  ;;  %v313_v21 = vld [vmem:[#allocation5 + $0x30] sm:$0xff]  ;;  %v314_v22 = vld [vmem:[#allocation5 + $0x38] sm:$0xff]  ;;  %v331_v23 = vld [vmem:[#allocation5 + $0xc0] sm:$0xff]  ;;  %s1402_s21 = scalar_lea.vmem %s1467_s3, %s720_s27  ;;  %s1068_s11 = scalar_lea.vmem %s1415_s10, 256 }
  0x77   : > { %v332_v24 = vld [vmem:[#allocation5 + $0xc8] sm:$0xff]  ;;  %v315_v26 = vld [vmem:[#allocation5 + $0x40] sm:$0xff]  ;;  %v839_v27 = vpack.c.bf16 %v314_v22, %v313_v21  ;;  %v422_v30 = vld [vmem:[#allocation7 + $0x10] sm:$0xff]  ;;  %p1069_p1 = scmp.ne.s32.totalorder %s1415_s10, %s1068_s11  ;;  %s1163_s18 = smov [#allocation8]  }
  0x78   : > { %v300_v25 = vld [vmem:[%s1383_s13 + $0x8] sm:$0xff]  ;;  %v420_v28 = vld [vmem:[#allocation7] sm:$0xff]  ;;  %v841_v31 = vpack.c.bf16 %v332_v24, %v331_v23  ;;  %v333_v33 = vld [vmem:[#allocation5 + $0xd0] sm:$0xff] }
  0x79   : > { %832 = vmatpush3.bf16.msra.mxu0 %v831_v13  ;;  %407 = vmatprep.mubr.f32.mxu0 %v300_v25  ;;  %v421_v29 = vld [vmem:[#allocation7 + $0x8] sm:$0xff]  ;;  %v423_v35 = vld [vmem:[#allocation7 + $0x18] sm:$0xff]  ;;  %v424_v38 = vld [vmem:[#allocation7 + $0x20] sm:$0xff]  ;;  %p1070_p7 = pnand %p1069_p1, %p1321_p9 }
  0x7a   : > { %834 = vmatprep.subr.bf16.mxu0 %v833_v14  ;;  %v316_v32 = vld [vmem:[#allocation5 + $0x48] sm:$0xff]  ;;  %v857_v34 = vpack.c.bf16 %v421_v29, %v420_v28  ;;  %v334_v36 = vld [vmem:[#allocation5 + $0xd8] sm:$0xff]  ;;  %v861_v37 = vpack.c.bf16 %v423_v35, %v422_v30  ;;  %v317_v42 = vld [vmem:[#allocation5 + $0x50] sm:$0xff] }
  0x7b   : > { %v425_v39 = vld [vmem:[#allocation7 + $0x28] sm:$0xff]  ;;  %v843_v40 = vpack.c.bf16 %v316_v32, %v315_v26  ;;  %v845_v41 = vpack.c.bf16 %v334_v36, %v333_v33  ;;  %v318_v43 = vld [vmem:[#allocation5 + $0x58] sm:$0xff]  ;;  %v335_v44 = vld [vmem:[#allocation5 + $0xe0] sm:$0xff]  ;;  %p1071_p12 = pneg %p1070_p7 }
  0x7c   : > { %858 = vmatprep.subr.bf16.mxu1 %v857_v34  ;;  %v865_v45 = vpack.c.bf16 %v425_v39, %v424_v38  ;;  %v336_v46 = vld [vmem:[#allocation5 + $0xe8] sm:$0xff]  ;;  %v426_v47 = vld [vmem:[#allocation7 + $0x30] sm:$0xff]  ;;  %v427_v48 = vld [vmem:[#allocation7 + $0x38] sm:$0xff]  ;;  %v847_v49 = vpack.c.bf16 %v318_v43, %v317_v42 }
  0x7d   : > { %836 = vmatpush3.bf16.msra.mxu0 %v835_v19  ;;  %860 = vmatpush3.bf16.msra.mxu1 %v857_v34  ;;  %v849_v50 = vpack.c.bf16 %v336_v46, %v335_v44  ;;  %v319_v51 = vld [vmem:[#allocation5 + $0x60] sm:$0xff]  ;;  %v320_v52 = vld [vmem:[#allocation5 + $0x68] sm:$0xff]  ;;  %v337_v53 = vld [vmem:[#allocation5 + $0xf0] sm:$0xff]  ;;  %v869_v54 = vpack.c.bf16 %v427_v48, %v426_v47 }
  0x7e   : > { %838 = vmatprep.subr.bf16.mxu0 %v837_v20  ;;  %862 = vmatprep.subr.bf16.mxu1 %v861_v37  ;;  %v338_v55 = vld [vmem:[#allocation5 + $0xf8] sm:$0xff]  ;;  %v428_v56 = vld [vmem:[#allocation7 + $0x40] sm:$0xff]  ;;  %v429_v57 = vld [vmem:[#allocation7 + $0x48] sm:$0xff]  ;;  %v851_v58 = vpack.c.bf16 %v320_v52, %v319_v51 }
  0x7f   : > { %v853_v59 = vpack.c.bf16 %v338_v55, %v337_v53  ;;  %v321_v60 = vld [vmem:[#allocation5 + $0x70] sm:$0xff]  ;;  %v322_v61 = vld [vmem:[#allocation5 + $0x78] sm:$0xff]  ;;  %v873_v62 = vpack.c.bf16 %v429_v57, %v428_v56  ;;  %v299_v0 = vld [vmem:[%s1383_s13] sm:$0xff] }
  0x80   : > { %v855_v63 = vpack.c.bf16 %v322_v61, %v321_v60  ;;  %v302_v1 = vld [vmem:[%s1383_s13 + $0x18] sm:$0xff]  ;;  %v301_v2 = vld [vmem:[%s1383_s13 + $0x10] sm:$0xff]  ;;  %v432_v6 = vld [vmem:[#allocation7 + $0x60] sm:$0xff]  ;;  %s1072_s13 = sshll.u32 %s1163_s18, 4  ;;  %s1073_s13 = int_to_ptr.vmem [resolvable:$false] %s1072_s13 }
  0x81   : > { %840 = vmatpush3.bf16.msra.mxu0 %v839_v27  ;;  %864 = vmatpush3.bf16.msra.mxu1 %v861_v37  ;;  %v430_v3 = vld [vmem:[#allocation7 + $0x50] sm:$0xff]  ;;  %v431_v4 = vld [vmem:[#allocation7 + $0x58] sm:$0xff]  ;;  %v433_v7 = vld [vmem:[#allocation7 + $0x68] sm:$0xff]  ;;  %s1074_s24 = scalar_lea.vmem %s1073_s13, 512  ;;  %p1075_p0 = scmp.lt.s32.totalorder %s1415_s10, %s1073_s13 }
  0x82   : > { %842 = vmatprep.subr.bf16.mxu0 %v841_v31  ;;  %866 = vmatprep.subr.bf16.mxu1 %v865_v45  ;;  %v877_v5 = vpack.c.bf16 %v431_v4, %v430_v3  ;;  %v881_v8 = vpack.c.bf16 %v433_v7, %v432_v6  ;;  %v434_v9 = vld [vmem:[#allocation7 + $0x70] sm:$0xff]  ;;  %v435_v10 = vld [vmem:[#allocation7 + $0x78] sm:$0xff]  ;;  %v721_v14 = vld [vmem:[%s1402_s21] ss:$0 sm:$0xff]  ;;  %p1076_p3 = scmp.lt.s32.totalorder %s1074_s24, %s1068_s11 }
  0x83   : > { %v885_v11 = vpack.c.bf16 %v435_v10, %v434_v9  ;;  %v722_v23 = vld [vmem:[%s1402_s21 + $0x1] ss:$0 sm:$0xff]  ;;  %v723_v44 = vld [vmem:[%s1402_s21 + $0x2] ss:$0 sm:$0xff]  ;;  %v724_v47 = vld [vmem:[%s1402_s21 + $0x3] ss:$0 sm:$0xff] }
  0x84   : > { %p1077_p5 = por %p1076_p3, %p1075_p0 }
  0x85   : > { %844 = vmatpush3.bf16.msra.mxu0 %v843_v40  ;;  %868 = vmatpush3.bf16.msra.mxu1 %v865_v45 }
  0x86   : > { %846 = vmatprep.subr.bf16.mxu0 %v845_v41  ;;  %870 = vmatprep.subr.bf16.mxu1 %v869_v54  ;;  %p1078_p2 = pnand %p1077_p5, %p1071_p12 }
  0x89   : > { %848 = vmatpush3.bf16.msra.mxu0 %v847_v49  ;;  %872 = vmatpush3.bf16.msra.mxu1 %v869_v54 }
  0x8a   : > { %850 = vmatprep.subr.bf16.mxu0 %v849_v50  ;;  %874 = vmatprep.subr.bf16.mxu1 %v873_v62 }
  0x8d   : > { %852 = vmatpush3.bf16.msra.mxu0 %v851_v58  ;;  %876 = vmatpush3.bf16.msra.mxu1 %v873_v62 }
  0x8e   : > { %854 = vmatprep.subr.bf16.mxu0 %v853_v59  ;;  %878 = vmatprep.subr.bf16.mxu1 %v877_v5 }
  0x91   : > { %856 = vmatpush3.bf16.msra.mxu0 %v855_v63  ;;  %880 = vmatpush3.bf16.msra.mxu1 %v877_v5 }
  0x92   : > { %882 = vmatprep.subr.bf16.mxu1 %v881_v8 }
  0x94   : > { %408 = vmatmul.mubr.f32.vlgmr.msra.gmra.mrb[0].mxu0 %v299_v0 }
  0x95   : > { %412 = vmatprep.mubr.f32.mxu0 %v302_v1  ;;  %884 = vmatpush3.bf16.msra.mxu1 %v881_v8 }
  0x96   : > { %886 = vmatprep.subr.bf16.mxu1 %v885_v11 }
  0x98   : > { %413 = vmatmul.mubr.f32.gmra.mrb[2].mxu0 %v301_v2 }
  0x99   : > { %888 = vmatpush3.bf16.msra.mxu1 %v885_v11 }
 0x167   : > { %v766_v12 = vpop.f32.mrb[0].mxu0 }
 0x168   : > { %v767_v13 = vpop.f32.mrb[1].mxu0 }
 0x169   : > { %v768_v15 = vadd.f32 %v767_v13, %v766_v12 }
 0x16b   : > { %v769_v16 = vpop.f32.mrb[2].mxu0  ;;  %v410_v17 = vadd.f32 %v768_v15, %v721_v14 }
 0x16c   : > { %v770_v18 = vpop.f32.mrb[3].mxu0 }
 0x16d   : > { %v771_v19 = vadd.f32 %v770_v18, %v769_v16  ;;  %v418_v20 = vmax.f32 %v410_v17, 0.0 }
 0x16f   : > { %v415_v21 = vadd.f32 %v771_v19, %v721_v14  ;;  %822 = vmatprep.mubr.f32.mxu1 %v418_v20 }
 0x171   : > { %v419_v22 = vmax.f32 %v415_v21, 0.0 }
 0x173   : > { %823 = vmatmul.mubr.f32.vlgmr.msra.gmra.mrb[0].mxu1 %v419_v22 }
 0x246   : > { %v824_v24 = vpop.f32.mrb[0].mxu1 }
 0x247   : > { %v506_v25 = vpop.f32.mrb[1].mxu1  ;;  %v512_v27 = vadd.f32 %v824_v24, %v722_v23 }
 0x248   : > { %v507_v26 = vadd.f32 %v722_v23, %v506_v25 }
 0x249   : > { %v516_v29 = vadd.f32 %v512_v27, %v415_v21 }
 0x24a   : > { %v515_v28 = vadd.f32 %v507_v26, %v410_v17 }
 0x24c   : > { %517 = vadd.xlane.f32.xlu0 %v515_v28 }
 0x250   : > { %519 = vadd.xlane.f32.xlu0 %v516_v29 }
 0x2d9   : > { %v518_v30 = vpop.xlane.xlu0 %517 }
 0x2da   : > { %v521_v31 = vmul.f32 0.0078125, %v518_v30 }
 0x2dc   : > { %v523_v32 = vsub.f32 %v515_v28, %v521_v31 }
 0x2dd   : > { %v520_v33 = vpop.xlane.xlu0 %519 }
 0x2de   : > { %v522_v34 = vmul.f32 0.0078125, %v520_v33  ;;  %v525_v35 = vmul.f32 %v523_v32, %v523_v32 }
 0x2e0   : > { %v524_v36 = vsub.f32 %v516_v29, %v522_v34  ;;  %527 = vadd.xlane.f32.xlu1 %v525_v35 }
 0x2e2   : > { %v526_v37 = vmul.f32 %v524_v36, %v524_v36 }
 0x2e4   : > { %529 = vadd.xlane.f32.xlu1 %v526_v37 }
 0x36d   : > { %v528_v38 = vpop.xlane.xlu1 %527 }
 0x36e   : > { %v531_v39 = vmul.f32 0.0078125, %v528_v38 }
 0x370   : > { %v533_v40 = vadd.f32 1e-05, %v531_v39 }
 0x371   : > { %v530_v41 = vpop.xlane.xlu1 %529 }
 0x372   : > { %970 = vrsqrt.f32 %v533_v40  ;;  %v532_v42 = vmul.f32 0.0078125, %v530_v41 }
 0x374   : > { %v534_v43 = vadd.f32 1e-05, %v532_v42 }
 0x376   : > { %972 = vrsqrt.f32 %v534_v43 }
 0x37c   : > { %v971_v45 = vpop.eup %970 }
 0x37d   : > { %v541_v46 = vmul.f32 %v971_v45, %v723_v44 }
 0x37f   : > { %v543_v48 = vmul.f32 %v541_v46, %v523_v32 }
 0x380   : > { %v973_v49 = vpop.eup %972 }
 0x381   : > { %v549_v50 = vadd.f32 %v724_v47, %v543_v48  ;;  %v542_v51 = vmul.f32 %v973_v49, %v723_v44 }
 0x383   : > { %v551_v52 = vmul.f32 %v549_v50, %v549_v50  ;;  %v544_v53 = vmul.f32 %v542_v51, %v524_v36 }
 0x385   : > { %553 = vadd.xlane.f32.xlu0 %v551_v52  ;;  %v550_v54 = vadd.f32 %v724_v47, %v544_v53 }
 0x387   : > { %v552_v55 = vmul.f32 %v550_v54, %v550_v54 }
 0x389   : > { %555 = vadd.xlane.f32.xlu1 %v552_v55 }
 0x412   : > { %v554_v56 = vpop.xlane.xlu0 %553 }
 0x413   : > { %v557_v57 = vmax.f32 %v554_v56, 1e-24 }
 0x415   : > { %974 = vrsqrt.f32 %v557_v57 }
 0x416   : > { %v556_v58 = vpop.xlane.xlu1 %555 }
 0x417   : > { %v558_v59 = vmax.f32 %v556_v58, 1e-24 }
 0x419   : > { %976 = vrsqrt.f32 %v558_v59 }
 0x41f   : > { %v975_v60 = vpop.eup %974 }
 0x420   : > { %v561_v61 = vmul.f32 %v975_v60, %v549_v50 }
 0x422   : > { %563 = vst [vmem:[%s292_s9] sm:$0xff] %v561_v61 }
 0x423   : > { %v977_v62 = vpop.eup %976 }
 0x424   : > { %v562_v63 = vmul.f32 %v977_v62, %v550_v54 }
 0x426   : > { %564 = vst [vmem:[%s292_s9 + $0x8] sm:$0xff] %v562_v63 }
 0x427   : > { %1081 = shalt.err (!%p1078_p2)
}
 0x428   : > { %s1082_s27 = scalar_lea.hbm %s1413_s30, 256  ;;  %s1086_s21 = scalar_lea.hbm %s1468_s4, 512 }
 0x429   : > { %p1083_p11 = scmp.ne.s32.totalorder %s1413_s30, %s1082_s27  ;;  %p1087_p6 = scmp.lt.u32.totalorder %s1413_s30, %s1468_s4 }
 0x42a   : > { %p1088_p8 = scmp.lt.u32.totalorder %s1086_s21, %s1082_s27  ;;  %p1090_p1 = scmp.lt.u32.totalorder %s1082_s27, %s1413_s30 }
 0x42b   : > { %p1084_p13 = pnand %p1083_p11, %p1321_p9 }
 0x42c   : > { %p1089_p10 = por %p1088_p8, %p1087_p6 }
 0x42d   : > { %p1085_p4 = pneg %p1084_p13 }
 0x42e   : > { %p1091_p7 = por %p1090_p1, %p1089_p10 }
 0x430   : > { %p1092_p12 = pnand %p1091_p7, %p1085_p4 }
 0x432   : > { %1095 = shalt.err (!%p1092_p12)
}
 0x433   : > { %s1164_s9 = smov 128   ;;  %s1165_s12 = smov 8  }
 0x434   : > { %895 = dma.vmem_to_hbm [thread:$0]  (%p1321_p9), %s1415_s10, 256, %s1413_s30, %s566_s5, %s1164_s9, %s1164_s9, %s1165_s12  }
 0x435 PF: > { %s596_s26 = sand.u32 1, %s1134_s15   ;;  %p1482_p0 = scmp.ne.s32.totalorder %s1474_s25, 0 }
 0x436   : > { %p1483_p3 = scmp.ge.s32.totalorder %s1154_s20, 2  ;;  %s597_s11 = scalar_lea.sflag [#allocation4], %s596_s26 }
 0x438   : > { %p909_p5 = pnand %p1483_p3, %p1482_p0 }
 0x43a   : > { %1129 = dma.done.wait (!%p909_p5), %s597_s11, 256  }
 0x43b   : > { %1131 = vsyncadd (!%p909_p5), %s597_s11, 4294967040  ;;  %s21_s20 = sadd.s32 1, %s1154_s20   ;;  %s1484_s15 = smov %s1138_s16 }
 0x43c   : > { %p18_p2 = scmp.ge.s32.totalorder %s21_s20, 4   ;;  %s1485_s16 = smov %s1142_s17 }
 0x43d   : > { %s1486_s17 = smov %s1333_s7  ;;  %s1487_s18 = smov %s1150_s19 }
 0x43e   : > { %s1488_s19 = smov %s1490_s28  ;;  %20 = sbr.rel (!%p18_p2) target bundleno = 7 (0x7), region = 94 }
 0x445   :  { %602 = vsyncpa [#allocation3], 1 }
 0x446   :  { %604 = vsyncpa [#allocation3 + $0x1], 1 }
 0x447   :  { %605 = vsyncpa [#allocation6], 1 }
 0x448   :  { %606 = vsyncpa [#allocation4], 1 }
 0x449   :  { %608 = vsyncpa [#allocation4 + $0x1], 1 }

// kernel: tpu_custom_call.1
= control target key start
LH: loop header
LB: loop body
LE: loop exit
PB: predicated region body
PF: predicated region fallthrough
CT: control target
= control target key end

     0   :  { %s1577_s0 = inlined_call_operand.hbm [shape: f32[2,16,256], index: 0, kind: input, shape index: {}]   ;;  %s1578_s1 = inlined_call_operand.hbm [shape: f32[2,256,128], index: 1, kind: input, shape index: {}]   ;;  %s1579_s2 = inlined_call_operand.hbm [shape: f32[2,128,128], index: 2, kind: input, shape index: {}]   ;;  %s1580_s3 = inlined_call_operand.vmem [shape: f32[2,4,128], index: 3, kind: input, shape index: {}]   ;;  %s1581_s4 = inlined_call_operand.hbm [shape: f32[2,16,128], index: 4, kind: output, shape index: {}]  }
   0x1   :  { %1587 = sst [smem:[#allocation14_spill]] %s1577_s0 }
   0x2   :  { %1588 = sst [smem:[#allocation15_spill]] %s1578_s1 }
   0x3   :  { %9 = vsyncpa [#allocation3], 0 }
   0x4   :  { %11 = vsyncpa [#allocation3 + $0x1], 0 }
   0x5   :  { %12 = vsyncpa [#allocation6], 0 }
   0x6   :  { %14 = vsyncpa [#allocation6 + $0x1], 0 }
   0x7   :  { %15 = vsyncpa [#allocation4], 0 }
   0x8   :  { %17 = vsyncpa [#allocation4 + $0x1], 0  ;;  %s1241_s15 = smov 0   ;;  %s1243_s16 = smov 0  }
   0x9   :  { %s1245_s17 = smov 0   ;;  %s1247_s18 = smov 0  }
   0xa   :  { %s1249_s19 = smov 0   ;;  %s1251_s20 = smov 0  }
   0xb LB: > { %s1272_s21 = sadd.s32 4294967295, %s1204_s20   ;;  %s756_s22 = sadd.s32 4294967294, %s1204_s20   ;;  %s1204_s20 = sphi %s1251_s20, %s23_s20   ;;  %s1200_s19 = sphi %s1249_s19, %s1613_s19   ;;  %s1196_s18 = sphi %s1247_s18, %s1612_s18   ;;  %s1192_s17 = sphi %s1245_s17, %s1611_s17   ;;  %s1188_s16 = sphi %s1243_s16, %s1610_s16   ;;  %s1184_s15 = sphi %s1241_s15, %s1609_s15  }
   0xc   : > { %s35_s23 = sadd.s32 1, %s1200_s19  ;;  %s44_s24 = sadd.s32 1, %s1192_s17 }
   0xd   : > { %p37_p0 = scmp.ge.s32.totalorder %s35_s23, 2  ;;  %p51_p1 = scmp.ne.s32.totalorder %s1192_s17, %s1188_s16 }
   0xe   : > { %p52_p2 = scmp.eq.s32.totalorder %s1204_s20, 0  ;;  %p57_p3 = scmp.ne.s32.totalorder %s1188_s16, %s1184_s15 }
   0xf   : > { %s1615_s23 = smov (%p37_p0, %s35_s23), 0  ;;  %p58_p5 = scmp.eq.s32.totalorder %s1272_s21, 0 }
  0x10   : > { %1589 = sst [smem:[#allocation12_spill]] %s1615_s23  ;;  %p1284_p4 = por %p52_p2, %p51_p1 }
  0x11   : > { %s39_s26 = ssub.s32 %s1200_s19, %s1615_s23  ;;  %p161_p6 = scmp.eq.s32.totalorder %s1272_s21, 1 }
  0x12   : > { %p42_p7 = scmp.eq.s32.totalorder %s39_s26, 0  ;;  %p1292_p8 = por %p58_p5, %p57_p3 }
  0x13   : > { %p1296_p9 = por %p161_p6, %p51_p1  ;;  %p167_p10 = scmp.eq.s32.totalorder %s756_s22, 1 }
  0x14   : > { %s1591_s27 = scalar_select %p1292_p8, 1, 0 }
  0x15   : > { %s1592_s28 = scalar_select %p1296_p9, 1, 0 }
  0x16   : > { %s1301_s29 = scalar_select %p42_p7, %s1192_s17, %s44_s24  }
  0x17   : > { %p1303_p11 = por %p167_p10, %p57_p3  ;;  %p964_p13 = scmp.lt.s32.totalorder %s1204_s20, 2 }
  0x18   : > { %1593 = sst [smem:[#allocation13_spill]] %s1301_s29  ;;  %s1310_s5 = sand.u32 1, %s1192_s17  }
  0x19   : > { %s1594_s30 = scalar_select %p1303_p11, 1, 0 }
  0x1a   : > { %s211_s6 = sand.u32 1, %s1204_s20   ;;  %s762_s7 = sshll.u32 %s1310_s5, 8 }
  0x1b   : > { %p1316_p0 = pnand %p964_p13, %p1284_p4  ;;  %s784_s9 = sshll.u32 %s1200_s19, 12 }
  0x1c   : > { %s1596_s1 = sld [smem:[#allocation15_spill]]  ;;  %s215_s13 = scalar_lea.vmem [#allocation5], %s762_s7 }
  0x1d   : > { %s222_s14 = sshll.u32 %s215_s13, 4  ;;  %s1328_s22 = scalar_lea.sflag [#allocation6], %s211_s6  ;;  %s1326_s14 = int_to_ptr.vmem [resolvable:$true] %s222_s14 }
  0x1e   : > { %p1334_p2 = pneg %p1316_p0 }
  0x22   : > { %s1324_s12 = scalar_lea.hbm %s1596_s1, %s784_s9  ;;  %s1033_s7 = scalar_lea.hbm %s1596_s1, 8192 }
  0x23   : > { %s1028_s24 = scalar_lea.hbm %s1324_s12, 4096  ;;  %p1034_p5 = scmp.lt.u32.totalorder %s1324_s12, %s1596_s1 }
  0x24   : > { %p1029_p1 = scmp.ne.s32.totalorder %s1324_s12, %s1028_s24  ;;  %p1035_p6 = scmp.lt.u32.totalorder %s1033_s7, %s1028_s24 }
  0x25   : > { %p1037_p10 = scmp.lt.u32.totalorder %s1028_s24, %s1324_s12 }
  0x26   : > { %p1031_p3 = pnand %p1334_p2, %p1029_p1  ;;  %p1036_p7 = por %p1035_p6, %p1034_p5 }
  0x28   : > { %p1032_p4 = pneg %p1031_p3  ;;  %p1038_p13 = por %p1037_p10, %p1036_p7 }
  0x2a   : > { %p1039_p12 = pnand %p1038_p13, %p1032_p4 }
  0x2c   : > { %1042 = shalt.err (!%p1039_p12)
}
  0x2d   : > { %s1043_s6 = scalar_lea.vmem %s1326_s14, 4096  ;;  %s1206_s13 = smov [#allocation5]  }
  0x2e   : > { %p1044_p1 = scmp.ne.s32.totalorder %s1326_s14, %s1043_s6  ;;  %s1048_s26 = sshll.u32 %s1206_s13, 4  ;;  %s1049_s26 = int_to_ptr.vmem [resolvable:$false] %s1048_s26 }
  0x2f   : > { %s1050_s9 = scalar_lea.vmem %s1049_s26, 8192  ;;  %p1051_p9 = scmp.lt.s32.totalorder %s1326_s14, %s1049_s26 }
  0x30   : > { %p1046_p3 = pnand %p1044_p1, %p1334_p2  ;;  %p1052_p8 = scmp.lt.s32.totalorder %s1050_s9, %s1043_s6 }
  0x32   : > { %p1047_p11 = pneg %p1046_p3  ;;  %p1053_p5 = por %p1052_p8, %p1051_p9 }
  0x34   : > { %p1054_p6 = pnand %p1053_p5, %p1047_p11 }
  0x36   : > { %1057 = shalt.err (!%p1054_p6)
}
  0x37   : > { %s1585_s24 = smov 128   ;;  %s1586_s7 = smov 8  }
  0x38   : > { %956 = dma.hbm_to_vmem [thread:$0]  (!%p1316_p0), %s1324_s12, 4096, %s1326_s14, %s1328_s22, %s1585_s24, %s1585_s24, %s1586_s7  }
  0x39   : > { %p768_p8 = scmp.ge.s32.totalorder %s1204_s20, 1  ;;  %p258_p9 = scmp.lt.s32.totalorder %s1204_s20, 3 }
  0x3a   : > { %s759_s11 = sshll.u32 %s1310_s5, 5  ;;  %s783_s6 = sshll.u32 %s1200_s19, 9 }
  0x3b   : > { %p1363_p11 = pnand %p768_p8, %p258_p9  ;;  %s1599_s0 = sld [smem:[#allocation14_spill]] }
  0x3c   : > { %s191_s1 = scalar_lea.vmem [#allocation2], %s759_s11  ;;  %s188_s12 = scalar_lea.sflag [#allocation3], %s1310_s5 }
  0x3d   : > { %s1598_s10 = scalar_select %p1363_p11, 1, 0 }
  0x3e   : > { %s201_s23 = sshll.u32 %s191_s1, 4  ;;  %s1374_s23 = int_to_ptr.vmem [resolvable:$true] %s201_s23 }
  0x41   : > { %s1372_s9 = scalar_lea.hbm %s1599_s0, %s783_s6  ;;  %s1063_s13 = scalar_lea.hbm %s1599_s0, 1024 }
  0x42   : > { %s1058_s14 = scalar_lea.hbm %s1372_s9, 512  ;;  %p1064_p10 = scmp.lt.u32.totalorder %s1372_s9, %s1599_s0 }
  0x43   : > { %p1059_p12 = scmp.ne.s32.totalorder %s1372_s9, %s1058_s14  ;;  %p1065_p13 = scmp.lt.u32.totalorder %s1063_s13, %s1058_s14 }
  0x44   : > { %p1067_p3 = scmp.lt.u32.totalorder %s1058_s14, %s1372_s9 }
  0x45   : > { %p1061_p4 = pnand %p1059_p12, %p1334_p2  ;;  %p1066_p1 = por %p1065_p13, %p1064_p10 }
  0x47   : > { %p1062_p7 = pneg %p1061_p4  ;;  %p1068_p5 = por %p1067_p3, %p1066_p1 }
  0x49   : > { %p1069_p6 = pnand %p1068_p5, %p1062_p7 }
  0x4b   : > { %1072 = shalt.err (!%p1069_p6)
}
  0x4c   : > { %s1073_s1 = scalar_lea.vmem %s1374_s23, 512  ;;  %s1209_s24 = smov [#allocation2]  }
  0x4d   : > { %p1074_p8 = scmp.ne.s32.totalorder %s1374_s23, %s1073_s1  ;;  %s1078_s7 = sshll.u32 %s1209_s24, 4  ;;  %s1079_s7 = int_to_ptr.vmem [resolvable:$false] %s1078_s7 }
  0x4e   : > { %s1080_s11 = scalar_lea.vmem %s1079_s7, 1024  ;;  %p1081_p4 = scmp.lt.s32.totalorder %s1374_s23, %s1079_s7 }
  0x4f   : > { %p1076_p9 = pnand %p1074_p8, %p1334_p2  ;;  %p1082_p11 = scmp.lt.s32.totalorder %s1080_s11, %s1073_s1 }
  0x51   : > { %p1077_p12 = pneg %p1076_p9  ;;  %p1083_p10 = por %p1082_p11, %p1081_p4 }
  0x53   : > { %p1084_p13 = pnand %p1083_p10, %p1077_p12 }
  0x55   : > { %1087 = shalt.err (!%p1084_p13)
}
  0x56   : > { %s1210_s14 = smov 256   ;;  %s1211_s13 = smov 16  }
  0x57   : > { %953 = dma.hbm_to_vmem [thread:$0]  (!%p1316_p0), %s1372_s9, 512, %s1374_s23, %s188_s12, %s1210_s14, %s1210_s14, %s1211_s13  }
  0x58   : > { %s765_s6 = sshll.u32 %s1310_s5, 7  ;;  %s785_s26 = sshll.u32 %s1200_s19, 11 }
  0x59   : > { %s1405_s1 = scalar_lea.hbm %s1579_s2, %s785_s26  ;;  %s236_s11 = scalar_lea.vmem [#allocation7], %s765_s6 }
  0x5a   : > { %s243_s0 = sshll.u32 %s236_s11, 4  ;;  %s1088_s29 = scalar_lea.hbm %s1405_s1, 2048  ;;  %s1407_s0 = int_to_ptr.vmem [resolvable:$true] %s243_s0 }
  0x5b   : > { %p1089_p11 = scmp.ne.s32.totalorder %s1405_s1, %s1088_s29  ;;  %s1093_s9 = scalar_lea.hbm %s1579_s2, 4096 }
  0x5c   : > { %p1094_p3 = scmp.lt.u32.totalorder %s1405_s1, %s1579_s2  ;;  %p1095_p5 = scmp.lt.u32.totalorder %s1093_s9, %s1088_s29 }
  0x5d   : > { %p1091_p7 = pnand %p1089_p11, %p1334_p2  ;;  %p1097_p8 = scmp.lt.u32.totalorder %s1088_s29, %s1405_s1 }
  0x5e   : > { %p1096_p6 = por %p1095_p5, %p1094_p3 }
  0x5f   : > { %p1092_p1 = pneg %p1091_p7 }
  0x60   : > { %p1098_p9 = por %p1097_p8, %p1096_p6 }
  0x62   : > { %p1099_p12 = pnand %p1098_p9, %p1092_p1 }
  0x64   : > { %1102 = shalt.err (!%p1099_p12)
}
  0x65   : > { %s1103_s13 = scalar_lea.vmem %s1407_s0, 2048  ;;  %s1212_s6 = smov [#allocation7]  }
  0x66   : > { %p1104_p4 = scmp.ne.s32.totalorder %s1407_s0, %s1103_s13  ;;  %s1108_s26 = sshll.u32 %s1212_s6, 4  ;;  %s1109_s26 = int_to_ptr.vmem [resolvable:$false] %s1108_s26 }
  0x67   : > { %s1110_s24 = scalar_lea.vmem %s1109_s26, 4096  ;;  %p1111_p11 = scmp.lt.s32.totalorder %s1407_s0, %s1109_s26 }
  0x68   : > { %p1106_p10 = pnand %p1104_p4, %p1334_p2  ;;  %p1112_p7 = scmp.lt.s32.totalorder %s1110_s24, %s1103_s13 }
  0x6a   : > { %p1107_p13 = pneg %p1106_p10  ;;  %p1113_p3 = por %p1112_p7, %p1111_p11 }
  0x6c   : > { %p1114_p5 = pnand %p1113_p3, %p1107_p13 }
  0x6e   : > { %1117 = shalt.err (!%p1114_p5)
}
  0x6f   : > { %s1600_s29 = smov 8   ;;  %s1601_s7 = smov 128  }
  0x70   : > { %959 = dma.hbm_to_vmem [thread:$0]  (!%p1316_p0), %s1405_s1, 2048, %s1407_s0, %s1328_s22, %s1601_s7, %s1601_s7, %s1600_s29  }
  0x71   : > { %p1602_p2 = scmp.ne.s32.totalorder %s1598_s10, 0 }
  0x72   : > { %s1437_s25 = sand.u32 (!%p1602_p2), 1, %s1188_s16   ;;  %p1603_p1 = scmp.ne.s32.totalorder (!%p1602_p2), %s1591_s27, 0 }
  0x73   : > { %262 = sbr.rel (%p1602_p2) target bundleno = 1090 (0x442), region = 36  ;;  %s769_s11 = sshll.u32 (!%p1602_p2), %s1437_s25, 5 }
  0x74   : > { %s265_s23 = scalar_lea.sflag (!%p1602_p2), [#allocation3], %s1437_s25  ;;  %s1441_s5 = scalar_lea.vmem (!%p1602_p2), [#allocation2], %s769_s11 }
  0x7a   : > { %1171 = dma.done.wait (%p1603_p1), %s265_s23, 512  }
  0x7b   : > { %1173 = vsyncadd (%p1603_p1), %s265_s23, 4294966784  ;;  %s273_s0 = sand.u32 1, %s1272_s21   ;;  %s770_s8 = sshll.u32 %s1437_s25, 8 }
  0x7c   : > { %s274_s22 = scalar_lea.sflag [#allocation6], %s273_s0  ;;  %s1449_s10 = scalar_lea.vmem [#allocation5], %s770_s8 }
  0x7d   : > { %1175 = dma.done.wait (%p1603_p1), %s274_s22, 6144  }
  0x7e   : > { %1177 = vsyncadd (%p1603_p1), %s274_s22, 4294961152  ;;  %v355_v0 = vld [vmem:[%s1449_s10 + $0x80] sm:$0xff]  ;;  %v356_v1 = vld [vmem:[%s1449_s10 + $0x88] sm:$0xff]  ;;  %s771_s21 = sshll.u32 %s1437_s25, 7  ;;  %p326_p0 = scmp.lt.s32.totalorder %s1196_s18, 1 }
  0x7f   : > { %v339_v2 = vld [vmem:[%s1449_s10] sm:$0xff]  ;;  %v878_v3 = vpack.c.bf16 %v356_v1, %v355_v0  ;;  %v340_v4 = vld [vmem:[%s1449_s10 + $0x8] sm:$0xff]  ;;  %v357_v5 = vld [vmem:[%s1449_s10 + $0x90] sm:$0xff]  ;;  %s1476_s27 = scalar_lea.vmem [#allocation7], %s771_s21  ;;  %s772_s6 = sshll.u32 %s1437_s25, 4 }
  0x80   : > { %v358_v6 = vld [vmem:[%s1449_s10 + $0x98] sm:$0xff]  ;;  %v880_v7 = vpack.c.bf16 %v340_v4, %v339_v2  ;;  %v341_v9 = vld [vmem:[%s1449_s10 + $0x10] sm:$0xff]  ;;  %v359_v11 = vld [vmem:[%s1449_s10 + $0xa0] sm:$0xff]  ;;  %s327_s1 = scalar_select %p326_p0, %s1196_s18, 1 }
  0x81   : > { %v882_v8 = vpack.c.bf16 %v358_v6, %v357_v5  ;;  %v342_v10 = vld [vmem:[%s1449_s10 + $0x18] sm:$0xff]  ;;  %879 = vmatprep.subr.bf16.mxu0 %v878_v3  ;;  %v360_v12 = vld [vmem:[%s1449_s10 + $0xa8] sm:$0xff]  ;;  %v343_v15 = vld [vmem:[%s1449_s10 + $0x20] sm:$0xff]  ;;  %s786_s26 = sshll.u32 %s1196_s18, 8  ;;  %s324_s24 = scalar_lea.vmem [#allocation8], %s772_s6 }
  0x82   : > { %881 = vmatpush3.bf16.msra.mxu0 %v880_v7  ;;  %v884_v13 = vpack.c.bf16 %v342_v10, %v341_v9  ;;  %v886_v14 = vpack.c.bf16 %v360_v12, %v359_v11  ;;  %v344_v16 = vld [vmem:[%s1449_s10 + $0x28] sm:$0xff]  ;;  %v361_v17 = vld [vmem:[%s1449_s10 + $0xb0] sm:$0xff]  ;;  %v362_v18 = vld [vmem:[%s1449_s10 + $0xb8] sm:$0xff]  ;;  %s773_s9 = sshll.u32 %s327_s1, 2  ;;  %s613_s29 = sshll.u32 %s324_s24, 4  ;;  %s1528_s29 = int_to_ptr.vmem [resolvable:$true] %s613_s29 }
  0x83   : > { %883 = vmatprep.subr.bf16.mxu0 %v882_v8  ;;  %v888_v19 = vpack.c.bf16 %v344_v16, %v343_v15  ;;  %v890_v20 = vpack.c.bf16 %v362_v18, %v361_v17  ;;  %v345_v21 = vld [vmem:[%s1449_s10 + $0x30] sm:$0xff]  ;;  %v346_v22 = vld [vmem:[%s1449_s10 + $0x38] sm:$0xff]  ;;  %v363_v23 = vld [vmem:[%s1449_s10 + $0xc0] sm:$0xff]  ;;  %s1515_s13 = scalar_lea.vmem %s1580_s3, %s773_s9  ;;  %s1526_s23 = scalar_lea.hbm %s1581_s4, %s786_s26 }
  0x84   : > { %v364_v24 = vld [vmem:[%s1449_s10 + $0xc8] sm:$0xff]  ;;  %v347_v26 = vld [vmem:[%s1449_s10 + $0x40] sm:$0xff]  ;;  %v892_v27 = vpack.c.bf16 %v346_v22, %v345_v21  ;;  %v454_v30 = vld [vmem:[%s1476_s27 + $0x10] sm:$0xff]  ;;  %s1118_s0 = scalar_lea.vmem %s1528_s29, 256  ;;  %p1604_p8 = scmp.ne.s32.totalorder %s1592_s28, 0 }
  0x85   : > { %v332_v25 = vld [vmem:[%s1441_s5 + $0x8] sm:$0xff]  ;;  %v452_v28 = vld [vmem:[%s1476_s27] sm:$0xff]  ;;  %v894_v31 = vpack.c.bf16 %v364_v24, %v363_v23  ;;  %v365_v33 = vld [vmem:[%s1449_s10 + $0xd0] sm:$0xff]  ;;  %p1119_p6 = scmp.ne.s32.totalorder %s1528_s29, %s1118_s0  ;;  %s1213_s18 = smov [#allocation8]  }
  0x86   : > { %885 = vmatpush3.bf16.msra.mxu0 %v884_v13  ;;  %439 = vmatprep.mubr.f32.mxu0 %v332_v25  ;;  %v453_v29 = vld [vmem:[%s1476_s27 + $0x8] sm:$0xff]  ;;  %v455_v35 = vld [vmem:[%s1476_s27 + $0x18] sm:$0xff]  ;;  %v456_v38 = vld [vmem:[%s1476_s27 + $0x20] sm:$0xff]  ;;  %s1122_s8 = sshll.u32 %s1213_s18, 4  ;;  %s1123_s8 = int_to_ptr.vmem [resolvable:$false] %s1122_s8 }
  0x87   : > { %887 = vmatprep.subr.bf16.mxu0 %v886_v14  ;;  %v348_v32 = vld [vmem:[%s1449_s10 + $0x48] sm:$0xff]  ;;  %v910_v34 = vpack.c.bf16 %v453_v29, %v452_v28  ;;  %v366_v36 = vld [vmem:[%s1449_s10 + $0xd8] sm:$0xff]  ;;  %v914_v37 = vpack.c.bf16 %v455_v35, %v454_v30  ;;  %v349_v42 = vld [vmem:[%s1449_s10 + $0x50] sm:$0xff]  ;;  %p1120_p9 = pnand %p1119_p6, %p1604_p8  ;;  %s1124_s22 = scalar_lea.vmem %s1123_s8, 512 }
  0x88   : > { %v457_v39 = vld [vmem:[%s1476_s27 + $0x28] sm:$0xff]  ;;  %v896_v40 = vpack.c.bf16 %v348_v32, %v347_v26  ;;  %v898_v41 = vpack.c.bf16 %v366_v36, %v365_v33  ;;  %v350_v43 = vld [vmem:[%s1449_s10 + $0x58] sm:$0xff]  ;;  %v367_v44 = vld [vmem:[%s1449_s10 + $0xe0] sm:$0xff]  ;;  %p1125_p4 = scmp.lt.s32.totalorder %s1528_s29, %s1123_s8  ;;  %p1126_p10 = scmp.lt.s32.totalorder %s1124_s22, %s1118_s0 }
  0x89   : > { %911 = vmatprep.subr.bf16.mxu1 %v910_v34  ;;  %v918_v45 = vpack.c.bf16 %v457_v39, %v456_v38  ;;  %v368_v46 = vld [vmem:[%s1449_s10 + $0xe8] sm:$0xff]  ;;  %v458_v47 = vld [vmem:[%s1476_s27 + $0x30] sm:$0xff]  ;;  %v459_v48 = vld [vmem:[%s1476_s27 + $0x38] sm:$0xff]  ;;  %v900_v49 = vpack.c.bf16 %v350_v43, %v349_v42  ;;  %p1121_p12 = pneg %p1120_p9 }
  0x8a   : > { %889 = vmatpush3.bf16.msra.mxu0 %v888_v19  ;;  %913 = vmatpush3.bf16.msra.mxu1 %v910_v34  ;;  %v902_v50 = vpack.c.bf16 %v368_v46, %v367_v44  ;;  %v351_v51 = vld [vmem:[%s1449_s10 + $0x60] sm:$0xff]  ;;  %v352_v52 = vld [vmem:[%s1449_s10 + $0x68] sm:$0xff]  ;;  %v369_v53 = vld [vmem:[%s1449_s10 + $0xf0] sm:$0xff]  ;;  %v922_v54 = vpack.c.bf16 %v459_v48, %v458_v47  ;;  %p1127_p13 = por %p1126_p10, %p1125_p4 }
  0x8b   : > { %891 = vmatprep.subr.bf16.mxu0 %v890_v20  ;;  %915 = vmatprep.subr.bf16.mxu1 %v914_v37  ;;  %v370_v55 = vld [vmem:[%s1449_s10 + $0xf8] sm:$0xff]  ;;  %v460_v56 = vld [vmem:[%s1476_s27 + $0x40] sm:$0xff]  ;;  %v461_v57 = vld [vmem:[%s1476_s27 + $0x48] sm:$0xff]  ;;  %v904_v58 = vpack.c.bf16 %v352_v52, %v351_v51 }
  0x8c   : > { %v906_v59 = vpack.c.bf16 %v370_v55, %v369_v53  ;;  %v353_v60 = vld [vmem:[%s1449_s10 + $0x70] sm:$0xff]  ;;  %v354_v61 = vld [vmem:[%s1449_s10 + $0x78] sm:$0xff]  ;;  %v926_v62 = vpack.c.bf16 %v461_v57, %v460_v56  ;;  %v331_v0 = vld [vmem:[%s1441_s5] sm:$0xff]  ;;  %p1128_p11 = pnand %p1127_p13, %p1121_p12 }
  0x8d   : > { %v908_v63 = vpack.c.bf16 %v354_v61, %v353_v60  ;;  %v334_v1 = vld [vmem:[%s1441_s5 + $0x18] sm:$0xff]  ;;  %v333_v2 = vld [vmem:[%s1441_s5 + $0x10] sm:$0xff]  ;;  %v464_v6 = vld [vmem:[%s1476_s27 + $0x60] sm:$0xff]  ;;  %s598_s5 = scalar_lea.sflag [#allocation4], %s1437_s25 }
  0x8e   : > { %893 = vmatpush3.bf16.msra.mxu0 %v892_v27  ;;  %917 = vmatpush3.bf16.msra.mxu1 %v914_v37  ;;  %v462_v3 = vld [vmem:[%s1476_s27 + $0x50] sm:$0xff]  ;;  %v463_v4 = vld [vmem:[%s1476_s27 + $0x58] sm:$0xff]  ;;  %v465_v7 = vld [vmem:[%s1476_s27 + $0x68] sm:$0xff] }
  0x8f   : > { %895 = vmatprep.subr.bf16.mxu0 %v894_v31  ;;  %919 = vmatprep.subr.bf16.mxu1 %v918_v45  ;;  %v930_v5 = vpack.c.bf16 %v463_v4, %v462_v3  ;;  %v934_v8 = vpack.c.bf16 %v465_v7, %v464_v6  ;;  %v466_v9 = vld [vmem:[%s1476_s27 + $0x70] sm:$0xff]  ;;  %v467_v10 = vld [vmem:[%s1476_s27 + $0x78] sm:$0xff]  ;;  %v774_v14 = vld [vmem:[%s1515_s13] ss:$0 sm:$0xff] }
  0x90   : > { %v938_v11 = vpack.c.bf16 %v467_v10, %v466_v9  ;;  %v775_v23 = vld [vmem:[%s1515_s13 + $0x1] ss:$0 sm:$0xff]  ;;  %v776_v44 = vld [vmem:[%s1515_s13 + $0x2] ss:$0 sm:$0xff]  ;;  %v777_v47 = vld [vmem:[%s1515_s13 + $0x3] ss:$0 sm:$0xff] }
  0x92   : > { %897 = vmatpush3.bf16.msra.mxu0 %v896_v40  ;;  %921 = vmatpush3.bf16.msra.mxu1 %v918_v45 }
  0x93   : > { %899 = vmatprep.subr.bf16.mxu0 %v898_v41  ;;  %923 = vmatprep.subr.bf16.mxu1 %v922_v54 }
  0x96   : > { %901 = vmatpush3.bf16.msra.mxu0 %v900_v49  ;;  %925 = vmatpush3.bf16.msra.mxu1 %v922_v54 }
  0x97   : > { %903 = vmatprep.subr.bf16.mxu0 %v902_v50  ;;  %927 = vmatprep.subr.bf16.mxu1 %v926_v62 }
  0x9a   : > { %905 = vmatpush3.bf16.msra.mxu0 %v904_v58  ;;  %929 = vmatpush3.bf16.msra.mxu1 %v926_v62 }
  0x9b   : > { %907 = vmatprep.subr.bf16.mxu0 %v906_v59  ;;  %931 = vmatprep.subr.bf16.mxu1 %v930_v5 }
  0x9e   : > { %909 = vmatpush3.bf16.msra.mxu0 %v908_v63  ;;  %933 = vmatpush3.bf16.msra.mxu1 %v930_v5 }
  0x9f   : > { %935 = vmatprep.subr.bf16.mxu1 %v934_v8 }
  0xa1   : > { %440 = vmatmul.mubr.f32.vlgmr.msra.gmra.mrb[0].mxu0 %v331_v0 }
  0xa2   : > { %444 = vmatprep.mubr.f32.mxu0 %v334_v1  ;;  %937 = vmatpush3.bf16.msra.mxu1 %v934_v8 }
  0xa3   : > { %939 = vmatprep.subr.bf16.mxu1 %v938_v11 }
  0xa5   : > { %445 = vmatmul.mubr.f32.gmra.mrb[2].mxu0 %v333_v2 }
  0xa6   : > { %941 = vmatpush3.bf16.msra.mxu1 %v938_v11 }
 0x174   : > { %v819_v12 = vpop.f32.mrb[0].mxu0 }
 0x175   : > { %v820_v13 = vpop.f32.mrb[1].mxu0 }
 0x176   : > { %v821_v15 = vadd.f32 %v820_v13, %v819_v12 }
 0x178   : > { %v822_v16 = vpop.f32.mrb[2].mxu0  ;;  %v442_v17 = vadd.f32 %v821_v15, %v774_v14 }
 0x179   : > { %v823_v18 = vpop.f32.mrb[3].mxu0 }
 0x17a   : > { %v824_v19 = vadd.f32 %v823_v18, %v822_v16  ;;  %v450_v20 = vmax.f32 %v442_v17, 0.0 }
 0x17c   : > { %v447_v21 = vadd.f32 %v824_v19, %v774_v14  ;;  %875 = vmatprep.mubr.f32.mxu1 %v450_v20 }
 0x17e   : > { %v451_v22 = vmax.f32 %v447_v21, 0.0 }
 0x180   : > { %876 = vmatmul.mubr.f32.vlgmr.msra.gmra.mrb[0].mxu1 %v451_v22 }
 0x253   : > { %v877_v24 = vpop.f32.mrb[0].mxu1 }
 0x254   : > { %v538_v25 = vpop.f32.mrb[1].mxu1  ;;  %v544_v27 = vadd.f32 %v877_v24, %v775_v23 }
 0x255   : > { %v539_v26 = vadd.f32 %v775_v23, %v538_v25 }
 0x256   : > { %v548_v29 = vadd.f32 %v544_v27, %v447_v21 }
 0x257   : > { %v547_v28 = vadd.f32 %v539_v26, %v442_v17 }
 0x259   : > { %549 = vadd.xlane.f32.xlu0 %v547_v28 }
 0x25d   : > { %551 = vadd.xlane.f32.xlu0 %v548_v29 }
 0x2e6   : > { %v550_v30 = vpop.xlane.xlu0 %549 }
 0x2e7   : > { %v553_v31 = vmul.f32 0.0078125, %v550_v30 }
 0x2e9   : > { %v555_v32 = vsub.f32 %v547_v28, %v553_v31 }
 0x2ea   : > { %v552_v33 = vpop.xlane.xlu0 %551 }
 0x2eb   : > { %v554_v34 = vmul.f32 0.0078125, %v552_v33  ;;  %v557_v35 = vmul.f32 %v555_v32, %v555_v32 }
 0x2ed   : > { %v556_v36 = vsub.f32 %v548_v29, %v554_v34  ;;  %559 = vadd.xlane.f32.xlu1 %v557_v35 }
 0x2ef   : > { %v558_v37 = vmul.f32 %v556_v36, %v556_v36 }
 0x2f1   : > { %561 = vadd.xlane.f32.xlu1 %v558_v37 }
 0x37a   : > { %v560_v38 = vpop.xlane.xlu1 %559 }
 0x37b   : > { %v563_v39 = vmul.f32 0.0078125, %v560_v38 }
 0x37d   : > { %v565_v40 = vadd.f32 1e-05, %v563_v39 }
 0x37e   : > { %v562_v41 = vpop.xlane.xlu1 %561 }
 0x37f   : > { %1020 = vrsqrt.f32 %v565_v40  ;;  %v564_v42 = vmul.f32 0.0078125, %v562_v41 }
 0x381   : > { %v566_v43 = vadd.f32 1e-05, %v564_v42 }
 0x383   : > { %1022 = vrsqrt.f32 %v566_v43 }
 0x389   : > { %v1021_v45 = vpop.eup %1020 }
 0x38a   : > { %v573_v46 = vmul.f32 %v1021_v45, %v776_v44 }
 0x38c   : > { %v575_v48 = vmul.f32 %v573_v46, %v555_v32 }
 0x38d   : > { %v1023_v49 = vpop.eup %1022 }
 0x38e   : > { %v581_v50 = vadd.f32 %v777_v47, %v575_v48  ;;  %v574_v51 = vmul.f32 %v1023_v49, %v776_v44 }
 0x390   : > { %v583_v52 = vmul.f32 %v581_v50, %v581_v50  ;;  %v576_v53 = vmul.f32 %v574_v51, %v556_v36 }
 0x392   : > { %585 = vadd.xlane.f32.xlu0 %v583_v52  ;;  %v582_v54 = vadd.f32 %v777_v47, %v576_v53 }
 0x394   : > { %v584_v55 = vmul.f32 %v582_v54, %v582_v54 }
 0x396   : > { %587 = vadd.xlane.f32.xlu1 %v584_v55 }
 0x41f   : > { %v586_v56 = vpop.xlane.xlu0 %585 }
 0x420   : > { %v589_v57 = vmax.f32 %v586_v56, 1e-24 }
 0x422   : > { %1024 = vrsqrt.f32 %v589_v57 }
 0x423   : > { %v588_v58 = vpop.xlane.xlu1 %587 }
 0x424   : > { %v590_v59 = vmax.f32 %v588_v58, 1e-24 }
 0x426   : > { %1026 = vrsqrt.f32 %v590_v59 }
 0x42c   : > { %v1025_v60 = vpop.eup %1024 }
 0x42d   : > { %v593_v61 = vmul.f32 %v1025_v60, %v581_v50 }
 0x42f   : > { %595 = vst [vmem:[%s324_s24] sm:$0xff] %v593_v61 }
 0x430   : > { %v1027_v62 = vpop.eup %1026 }
 0x431   : > { %v594_v63 = vmul.f32 %v1027_v62, %v582_v54 }
 0x433   : > { %596 = vst [vmem:[%s324_s24 + $0x8] sm:$0xff] %v594_v63 }
 0x434   : > { %1131 = shalt.err (!%p1128_p11)
}
 0x435   : > { %s1132_s10 = scalar_lea.hbm %s1526_s23, 256  ;;  %s1136_s1 = scalar_lea.hbm %s1581_s4, 512 }
 0x436   : > { %p1133_p7 = scmp.ne.s32.totalorder %s1526_s23, %s1132_s10  ;;  %p1137_p2 = scmp.lt.u32.totalorder %s1526_s23, %s1581_s4 }
 0x437   : > { %p1138_p1 = scmp.lt.u32.totalorder %s1136_s1, %s1132_s10  ;;  %p1140_p6 = scmp.lt.u32.totalorder %s1132_s10, %s1526_s23 }
 0x438   : > { %p1134_p3 = pnand %p1133_p7, %p1604_p8 }
 0x439   : > { %p1139_p0 = por %p1138_p1, %p1137_p2 }
 0x43a   : > { %p1135_p5 = pneg %p1134_p3 }
 0x43b   : > { %p1141_p9 = por %p1140_p6, %p1139_p0 }
 0x43d   : > { %p1142_p12 = pnand %p1141_p9, %p1135_p5 }
 0x43f   : > { %1145 = shalt.err (!%p1142_p12)
}
 0x440   : > { %s1214_s14 = smov 128   ;;  %s1215_s13 = smov 8  }
 0x441   : > { %948 = dma.vmem_to_hbm [thread:$0]  (%p1604_p8), %s1528_s29, 256, %s1526_s23, %s598_s5, %s1214_s14, %s1214_s14, %s1215_s13  }
 0x442 PF: > { %s628_s6 = sand.u32 1, %s1184_s15   ;;  %p1605_p4 = scmp.ne.s32.totalorder %s1594_s30, 0 }
 0x443   : > { %p1606_p10 = scmp.ge.s32.totalorder %s1204_s20, 2  ;;  %s629_s26 = scalar_lea.sflag [#allocation4], %s628_s6 }
 0x445   : > { %p961_p13 = pnand %p1606_p10, %p1605_p4 }
 0x447   : > { %1179 = dma.done.wait (!%p961_p13), %s629_s26, 256  }
 0x448   : > { %1181 = vsyncadd (!%p961_p13), %s629_s26, 4294967040  ;;  %s23_s20 = sadd.s32 1, %s1204_s20   ;;  %s1607_s24 = sld [smem:[#allocation13_spill]] }
 0x449   : > { %p20_p11 = scmp.ge.s32.totalorder %s23_s20, 4   ;;  %s1608_s28 = sld [smem:[#allocation12_spill]] }
 0x44a   : > { %s1609_s15 = smov %s1188_s16  ;;  %s1610_s16 = smov %s1192_s17 }
 0x44b   : > { %s1612_s18 = smov %s1200_s19  ;;  %22 = sbr.rel (!%p20_p11) target bundleno = 11 (0xb), region = 108 }
 0x44e   : > { %s1611_s17 = smov %s1607_s24 }
 0x44f   : > { %s1613_s19 = smov %s1608_s28 }
 0x452   :  { %634 = vsyncpa [#allocation3], 1 }
 0x453   :  { %636 = vsyncpa [#allocation3 + $0x1], 1 }
 0x454   :  { %637 = vsyncpa [#allocation6], 1 }
 0x455   :  { %639 = vsyncpa [#allocation6 + $0x1], 1 }
 0x456   :  { %640 = vsyncpa [#allocation4], 1 }
 0x457   :  { %642 = vsyncpa [#allocation4 + $0x1], 1 }

</bundles_post_ra>
